<compile_context>
chip_gen: v7x
topology: tpu7x:2x2x1
jax: 0.10.0
libtpu: 0.0.40
codegen_flags: <defaults>
</compile_context>

<pallas_src>
import functools

import jax
import jax.numpy as jnp
from jax.experimental import pallas as pl
from jax.experimental.pallas import tpu as pltpu

# Scoped-VMEM budget: leaves headroom on v7x (64 MiB physical), fine on v5e/v6e.
_VMEM_LIMIT = 32 * 1024 * 1024
# Target size for one stage-b input row block (bf16 bytes); keeps the
# double-buffered blocks well under the scoped limit on every generation.
_STAGE_B_IN_BLOCK_BUDGET = 3 * 1024 * 1024


# ---------------------------------------------------------------------------
# stage a: 1x1 conv + folded BN + ReLU   (M-tiled matmul)
# ---------------------------------------------------------------------------
def _mm_bn_act_kernel(x_ref, w_ref, scale_ref, bias_ref, o_ref, *, relu):
    x = x_ref[...].astype(jnp.bfloat16)
    acc = jnp.dot(x, w_ref[...], preferred_element_type=jnp.float32)
    y = acc * scale_ref[...] + bias_ref[...]          # f32 epilogue
    if relu:
        y = jnp.maximum(y, 0.0)
    o_ref[...] = y.astype(o_ref.dtype)


def conv1x1_bn_act(x2d, w, scale, bias, *, relu, out_dtype):
    M, K = x2d.shape
    C = w.shape[1]
    # TODO(synk): for very wide layers (K, C ~ 2K) on v7x add a Cout grid axis
    # or drop TM to 256 to keep resident weight + tiles under the VMEM cap.
    TM = M if M <= 512 else 512
    grid = (pl.cdiv(M, TM),)
    return pl.pallas_call(
        functools.partial(_mm_bn_act_kernel, relu=relu),
        out_shape=jax.ShapeDtypeStruct((M, C), out_dtype),
        grid=grid,
        in_specs=[
            pl.BlockSpec((TM, K), lambda i: (i, 0)),
            pl.BlockSpec((K, C), lambda i: (0, 0)),
            pl.BlockSpec((1, C), lambda i: (0, 0)),
            pl.BlockSpec((1, C), lambda i: (0, 0)),
        ],
        out_specs=pl.BlockSpec((TM, C), lambda i: (i, 0)),
        compiler_params=pltpu.CompilerParams(
            dimension_semantics=("parallel",),
            vmem_limit_bytes=_VMEM_LIMIT),
        cost_estimate=pl.CostEstimate(
            flops=2 * M * K * C, transcendentals=0,
            bytes_accessed=M * K * 4 + K * C * 2 + M * C * 2),
    )(x2d, w, scale.reshape(1, C), bias.reshape(1, C))


# ---------------------------------------------------------------------------
# stage b: grouped 3x3 strided conv + folded BN + ReLU, fused SE avg-pool
# ---------------------------------------------------------------------------
def _grouped_conv3x3_kernel(x_ref, w_ref, scale_ref, bias_ref, o_ref, pool_ref,
                            *, s, th, Wo, groups, cg, inv_hw):
    # x_ref   : (1, s*s, th+dmax, Lw, C)  phase-decomposed padded row block (bf16)
    # w_ref   : (groups, 9*cg, cg)        tap-major fused weights (bf16)
    # o_ref   : (1, th, Wo, C)            conv + BN + ReLU output rows (bf16)
    # pool_ref: (1, 1, C)                 SE global average pool (f32, accumulating)
    r = pl.program_id(1)

    @pl.when(r == 0)
    def _():
        pool_ref[...] = jnp.zeros_like(pool_ref)

    for g in range(groups):
        # per-group channel slice hoisted out of the tap loop (one narrow load)
        xg = x_ref[0, :, :, :, pl.ds(g * cg, cg)]      # (s*s, th+dmax, Lw, cg)
        taps = []
        for kh in range(3):
            for kw in range(3):
                ph, dh = kh % s, kh // s
                pw, dw = kw % s, kw // s
                taps.append(xg[ph * s + pw, dh:dh + th, dw:dw + Wo, :]
                            .reshape(th * Wo, cg))
        # single K = 9*cg contraction per group: fills the MXU, accumulation
        # stays in the MXU result buffer (no 8 VPU f32 adds per group).
        # NOTE: when Wo % 8 != 0 the reshape above is a sublane relayout.
        xcat = jnp.concatenate(taps, axis=-1)          # (th*Wo, 9*cg) bf16
        acc = jnp.dot(xcat, w_ref[g], preferred_element_type=jnp.float32)
        sc = scale_ref[:, pl.ds(g * cg, cg)]
        bi = bias_ref[:, pl.ds(g * cg, cg)]
        y = jnp.maximum(acc * sc + bi, 0.0)            # f32 epilogue, per group
        # per-group lane-slice store: no full-width f32 concat kept live
        o_ref[0, :, :, pl.ds(g * cg, cg)] = (
            y.reshape(th, Wo, cg).astype(o_ref.dtype))
        # fused SE global-average-pool, accumulated across row blocks
        pool_ref[0, :, pl.ds(g * cg, cg)] += (
            jnp.sum(y, axis=0, keepdims=True) * inv_hw)


def _pick_row_tile(Ho, C, s, Lw, dmax):
    # largest divisor of Ho whose bf16 input block fits the per-block budget
    for th in range(Ho, 0, -1):
        if Ho % th:
            continue
        if s * s * (th + dmax) * Lw * C * 2 <= _STAGE_B_IN_BLOCK_BUDGET or th == 1:
            return th
    return Ho


def conv3x3_grouped_bn_relu_pool(x, w, scale, bias, *, stride, groups,
                                 row_tile=None):
    """Grouped 3x3 conv (pad=1) + folded BN + ReLU, with fused global avg pool.

    The 3x3 tap expansion happens inside the kernel.  The only wrapper-side
    data movement is ONE fused XLA copy pass (pad + stride-phase decomposition
    + row-block gather with a small halo) so that strided taps are contiguous
    slices in VMEM -- no 9x im2col tensor ever hits HBM.
    """
    N, H, W, C = x.shape
    assert C % groups == 0
    cg = C // groups
    s = stride
    Ho = (H + 2 - 3) // s + 1
    Wo = (W + 2 - 3) // s + 1
    Hp, Wp = H + 2, W + 2
    Lh, Lw = -(-Hp // s), -(-Wp // s)
    dmax = 2 // s                        # extra phase rows needed below a block

    # TODO(synk): fold this single layout pass into stage a's out_spec (or use
    # in-kernel masked boundary taps for stride=1) to save one HBM round trip.
    xp = jnp.pad(x, ((0, 0),
                     (1, 1 + (Lh * s - Hp)),
                     (1, 1 + (Lw * s - Wp)),
                     (0, 0)))
    xph = (xp.reshape(N, Lh, s, Lw, s, C)
             .transpose(0, 2, 4, 1, 3, 5)
             .reshape(N, s * s, Lh, Lw, C))

    th = row_tile if row_tile is not None else _pick_row_tile(Ho, C, s, Lw, dmax)
    assert Ho % th == 0, (Ho, th)
    n_rb = Ho // th
    ridx = jnp.arange(n_rb)[:, None] * th + jnp.arange(th + dmax)[None, :]
    xrb = (xph[:, :, ridx]                    # (N, s*s, n_rb, th+dmax, Lw, C)
             .transpose(0, 2, 1, 3, 4, 5)
             .reshape(N * n_rb, s * s, th + dmax, Lw, C))

    # tap-major fused weight: w_fused[g, t*cg + ci, co] = w[t, g, ci, co]
    w_fused = w.transpose(1, 0, 2, 3).reshape(groups, 9 * cg, cg)

    kernel = functools.partial(_grouped_conv3x3_kernel, s=s, th=th, Wo=Wo,
                               groups=groups, cg=cg, inv_hw=1.0 / (Ho * Wo))
    return pl.pallas_call(
        kernel,
        out_shape=(jax.ShapeDtypeStruct((N, Ho, Wo, C), jnp.bfloat16),
                   jax.ShapeDtypeStruct((N, 1, C), jnp.float32)),
        grid=(N, n_rb),
        in_specs=[
            pl.BlockSpec((1, s * s, th + dmax, Lw, C),
                         lambda n, r: (n * n_rb + r, 0, 0, 0, 0)),
            pl.BlockSpec((groups, 9 * cg, cg), lambda n, r: (0, 0, 0)),
            pl.BlockSpec((1, C), lambda n, r: (0, 0)),
            pl.BlockSpec((1, C), lambda n, r: (0, 0)),
        ],
        out_specs=(pl.BlockSpec((1, th, Wo, C), lambda n, r: (n, r, 0, 0)),
                   pl.BlockSpec((1, 1, C), lambda n, r: (n, 0, 0))),
        compiler_params=pltpu.CompilerParams(
            dimension_semantics=("parallel", "arbitrary"),
            vmem_limit_bytes=_VMEM_LIMIT),
        cost_estimate=pl.CostEstimate(
            flops=2 * N * Ho * Wo * 9 * cg * C, transcendentals=0,
            bytes_accessed=(N * n_rb * s * s * (th + dmax) * Lw * C * 2
                            + groups * 9 * cg * cg * 2
                            + N * Ho * Wo * C * 2 + N * C * 4)),
    )(xrb, w_fused, scale.reshape(1, C), bias.reshape(1, C))


# ---------------------------------------------------------------------------
# stage c: SE excitation + gating fused into the 1x1 conv + folded BN kernel
# ---------------------------------------------------------------------------
def _gated_c_kernel(x_ref, p_ref, w1_ref, b1_ref, w2_ref, b2_ref,
                    w_ref, scale_ref, bias_ref, o_ref, gate_ref):
    # Gate computed once per image (t == 0) into a small VMEM scratch and
    # reused across spatial tiles; gating multiply stays in bf16.
    @pl.when(pl.program_id(1) == 0)
    def _():
        p = p_ref[0].astype(jnp.bfloat16)                       # (1, Cin)
        s1 = jnp.dot(p, w1_ref[...],
                     preferred_element_type=jnp.float32) + b1_ref[...]
        s1 = jnp.maximum(s1, 0.0)
        s2 = jnp.dot(s1.astype(jnp.bfloat16), w2_ref[...],
                     preferred_element_type=jnp.float32) + b2_ref[...]
        gate_ref[...] = jax.nn.sigmoid(s2).astype(gate_ref.dtype)

    xg = x_ref[0] * gate_ref[...]                               # bf16 (TS, Cin)
    acc = jnp.dot(xg, w_ref[...], preferred_element_type=jnp.float32)
    o_ref[0] = (acc * scale_ref[...] + bias_ref[...]).astype(o_ref.dtype)


def gated_conv1x1_bn_se(x3d, pooled, se_w1, se_b1, se_w2, se_b2,
                        w, scale, bias, *, out_dtype=jnp.bfloat16):
    N, HW, Cin = x3d.shape
    Cout = w.shape[1]
    Wse = se_w1.shape[1]
    # TS = 512 keeps double-buffered bf16 in/out tiles + resident weight inside
    # v7x's smaller VMEM; v5e/v6e have ample headroom.
    TS = HW if HW <= 512 else 512
    grid = (N, pl.cdiv(HW, TS))
    return pl.pallas_call(
        _gated_c_kernel,
        out_shape=jax.ShapeDtypeStruct((N, HW, Cout), out_dtype),
        grid=grid,
        in_specs=[
            pl.BlockSpec((1, TS, Cin), lambda n, t: (n, t, 0)),
            pl.BlockSpec((1, 1, Cin), lambda n, t: (n, 0, 0)),
            pl.BlockSpec((Cin, Wse), lambda n, t: (0, 0)),
            pl.BlockSpec((1, Wse), lambda n, t: (0, 0)),
            pl.BlockSpec((Wse, Cin), lambda n, t: (0, 0)),
            pl.BlockSpec((1, Cin), lambda n, t: (0, 0)),
            pl.BlockSpec((Cin, Cout), lambda n, t: (0, 0)),
            pl.BlockSpec((1, Cout), lambda n, t: (0, 0)),
            pl.BlockSpec((1, Cout), lambda n, t: (0, 0)),
        ],
        out_specs=pl.BlockSpec((1, TS, Cout), lambda n, t: (n, t, 0)),
        scratch_shapes=[pltpu.VMEM((1, Cin), jnp.bfloat16)],
        compiler_params=pltpu.CompilerParams(
            dimension_semantics=("parallel", "arbitrary"),
            vmem_limit_bytes=_VMEM_LIMIT),
        cost_estimate=pl.CostEstimate(
            flops=2 * N * HW * Cin * Cout, transcendentals=N * Cin,
            bytes_accessed=(N * HW * Cin * 2 + Cin * Cout * 2
                            + N * HW * Cout * jnp.dtype(out_dtype).itemsize)),
    )(x3d, pooled, se_w1, se_b1.reshape(1, Wse), se_w2, se_b2.reshape(1, Cin),
      w, scale.reshape(1, Cout), bias.reshape(1, Cout))


# ---------------------------------------------------------------------------
# Parameter construction (inference-mode, BN folded) and forward pass
# ---------------------------------------------------------------------------
def fold_bn(key, c, eps=1e-5):
    k1, k2, k3, k4 = jax.random.split(key, 4)
    gamma = 1.0 + 0.1 * jax.random.normal(k1, (c,))
    beta = 0.1 * jax.random.normal(k2, (c,))
    mean = 0.1 * jax.random.normal(k3, (c,))
    var = 1.0 + 0.1 * jnp.abs(jax.random.normal(k4, (c,)))
    scale = gamma / jnp.sqrt(var + eps)
    bias = beta - mean * scale
    return scale.astype(jnp.float32), bias.astype(jnp.float32)


def init_bottleneck(key, w_in, w_out, stride, hp):
    w_b = int(round(w_out * hp['bot_mul']))
    w_se = int(round(w_in * hp['se_r']))
    assert w_b % hp['group_w'] == 0
    groups = w_b // hp['group_w']
    cg = w_b // groups
    assert groups * cg == w_b
    ks = jax.random.split(key, 10)
    wts = {}
    wts['a_w'] = (0.1 * jax.random.normal(ks[0], (w_in, w_b))).astype(jnp.bfloat16)
    wts['a_scale'], wts['a_bias'] = fold_bn(ks[1], w_b)
    wts['b_w'] = (0.1 * jax.random.normal(ks[2], (9, groups, cg, cg))).astype(jnp.bfloat16)
    wts['b_scale'], wts['b_bias'] = fold_bn(ks[3], w_b)
    wts['se_w1'] = (0.1 * jax.random.normal(ks[4], (w_b, w_se))).astype(jnp.bfloat16)
    wts['se_b1'] = (0.1 * jax.random.normal(ks[5], (w_se,))).astype(jnp.float32)
    wts['se_w2'] = (0.1 * jax.random.normal(ks[6], (w_se, w_b))).astype(jnp.bfloat16)
    wts['se_b2'] = (0.1 * jax.random.normal(ks[7], (w_b,))).astype(jnp.float32)
    wts['c_w'] = (0.1 * jax.random.normal(ks[8], (w_b, w_out))).astype(jnp.bfloat16)
    wts['c_scale'], wts['c_bias'] = fold_bn(ks[9], w_out)
    return wts, stride, groups


def bottleneck_transform_forward(x, wts, *, stride, groups, row_tile=None,
                                 out_dtype=jnp.bfloat16):
    N, H, W, w_in = x.shape
    w_b = wts['a_w'].shape[1]
    w_out = wts['c_w'].shape[1]

    # a: 1x1 conv + BN + ReLU
    a = conv1x1_bn_act(x.reshape(N * H * W, w_in), wts['a_w'],
                       wts['a_scale'], wts['a_bias'],
                       relu=True, out_dtype=jnp.bfloat16)
    a = a.reshape(N, H, W, w_b)

    # b: grouped 3x3 strided conv + BN + ReLU, SE average-pool fused in
    b, pooled = conv3x3_grouped_bn_relu_pool(a, wts['b_w'], wts['b_scale'],
                                             wts['b_bias'], stride=stride,
                                             groups=groups, row_tile=row_tile)
    _, Ho, Wo, _ = b.shape

    # c: SE excitation + channel gating + 1x1 conv + BN in a single kernel
    c = gated_conv1x1_bn_se(b.reshape(N, Ho * Wo, w_b), pooled,
                            wts['se_w1'], wts['se_b1'],
                            wts['se_w2'], wts['se_b2'],
                            wts['c_w'], wts['c_scale'], wts['c_bias'],
                            out_dtype=out_dtype)
    return c.reshape(N, Ho, Wo, w_out)


# ---------------------------------------------------------------------------
# pure-JAX reference (f32) for numerical validation
# ---------------------------------------------------------------------------
def bottleneck_ref(x, wts, *, stride, groups):
    f32 = jnp.float32
    w_b = wts['a_w'].shape[1]
    cg = w_b // groups
    a = jnp.einsum('nhwc,cd->nhwd', x.astype(f32), wts['a_w'].astype(f32))
    a = jnp.maximum(a * wts['a_scale'] + wts['a_bias'], 0.0)
    wb = wts['b_w'].astype(f32).reshape(3, 3, groups, cg, cg)
    wb = wb.transpose(0, 1, 3, 2, 4).reshape(3, 3, cg, w_b)       # HWIO
    b = jax.lax.conv_general_dilated(
        a, wb, window_strides=(stride, stride), padding=((1, 1), (1, 1)),
        dimension_numbers=('NHWC', 'HWIO', 'NHWC'), feature_group_count=groups)
    b = jnp.maximum(b * wts['b_scale'] + wts['b_bias'], 0.0)
    p = jnp.mean(b, axis=(1, 2))
    s1 = jnp.maximum(p @ wts['se_w1'].astype(f32) + wts['se_b1'], 0.0)
    gate = jax.nn.sigmoid(s1 @ wts['se_w2'].astype(f32) + wts['se_b2'])
    bg = b * gate[:, None, None, :]
    c = jnp.einsum('nhwc,cd->nhwd', bg, wts['c_w'].astype(f32))
    return c * wts['c_scale'] + wts['c_bias']


# ---------------------------------------------------------------------------
if __name__ == "__main__":
    key = jax.random.PRNGKey(0)
    kx, kp = jax.random.split(key)

    # small RegNet-ish config: w_in=8 -> w_out=16, stride 2, groups=2, w_se=2
    N, H, W, w_in = 2, 16, 16, 8
    w_out, stride = 16, 2
    hp = {'bot_mul': 1.0, 'group_w': 8, 'se_r': 0.25}

    x = jax.random.normal(kx, (N, H, W, w_in), dtype=jnp.float32)
    wts, stride_, groups = init_bottleneck(kp, w_in, w_out, stride, hp)

    ref = bottleneck_ref(x, wts, stride=stride_, groups=groups)
    Ho = (H + 2 - 3) // stride + 1
    Wo = (W + 2 - 3) // stride + 1

    # row_tile=4 exercises the multi-row-block path (accumulating pool output);
    # row_tile=None exercises the auto (whole-image block) path.
    for rt in (4, None):
        fwd = jax.jit(functools.partial(bottleneck_transform_forward,
                                        stride=stride_, groups=groups,
                                        row_tile=rt))
        out = jax.block_until_ready(fwd(x, wts))
        assert out.shape == (N, Ho, Wo, w_out), out.shape
        outf = out.astype(jnp.float32)
        assert bool(jnp.all(jnp.isfinite(outf)))
        assert bool(jnp.allclose(outf, ref, atol=2e-2, rtol=2e-2)), (
            rt, float(jnp.max(jnp.abs(outf - ref))))
    print("KERNEL_OK")
</pallas_src>

<mosaic_0001>
module attributes {stable_mosaic.version = 11 : i64} {
  func.func @_mm_bn_act_kernel(%arg0: i32, %arg1: memref<512x8xf32, #tpu.memory_space<vmem>>, %arg2: memref<8x16xbf16, #tpu.memory_space<vmem>>, %arg3: memref<1x16xf32, #tpu.memory_space<vmem>>, %arg4: memref<1x16xf32, #tpu.memory_space<vmem>>, %arg5: memref<512x16xbf16, #tpu.memory_space<vmem>>) attributes {dimension_semantics = [#tpu.dimension_semantics<parallel>], iteration_bounds = array<i64: 1>, scalar_prefetch = 0 : i64, scratch_operands = 0 : i64, tpu.core_type = #tpu.core_type<tc>, window_params = [{transform_indices = @transform_0, window_bounds = array<i64: 512, 8>}, {pipeline_mode = #tpu.pipeline_mode<synchronous>, transform_indices = @transform_1, window_bounds = array<i64: 8, 16>}, {pipeline_mode = #tpu.pipeline_mode<synchronous>, transform_indices = @transform_2, window_bounds = array<i64: 1, 16>}, {pipeline_mode = #tpu.pipeline_mode<synchronous>, transform_indices = @transform_3, window_bounds = array<i64: 1, 16>}, {transform_indices = @transform_4, window_bounds = array<i64: 512, 16>}]} {
    %c0 = arith.constant 0 : index
    %c0_0 = arith.constant 0 : index
    %0 = vector.load %arg1[%c0, %c0_0] : memref<512x8xf32, #tpu.memory_space<vmem>>, vector<512x8xf32>
    %1 = arith.truncf %0 : vector<512x8xf32> to vector<512x8xbf16>
    %c0_1 = arith.constant 0 : index
    %c0_2 = arith.constant 0 : index
    %2 = vector.load %arg2[%c0_1, %c0_2] : memref<8x16xbf16, #tpu.memory_space<vmem>>, vector<8x16xbf16>
    %cst = arith.constant dense<0.000000e+00> : vector<512x16xf32>
    %3 = tpu.matmul %1, %2, %cst {dimension_numbers = #tpu.dot_dimension_numbers<[1], [0], [0], [1], [0, 0, 1, 1], [], []>} : vector<512x8xbf16>, vector<8x16xbf16>, vector<512x16xf32> -> vector<512x16xf32>
    %c0_3 = arith.constant 0 : index
    %c0_4 = arith.constant 0 : index
    %4 = vector.load %arg3[%c0_3, %c0_4] : memref<1x16xf32, #tpu.memory_space<vmem>>, vector<1x16xf32>
    %5 = vector.broadcast %4 : vector<1x16xf32> to vector<512x16xf32>
    %6 = arith.mulf %3, %5 : vector<512x16xf32>
    %c0_5 = arith.constant 0 : index
    %c0_6 = arith.constant 0 : index
    %7 = vector.load %arg4[%c0_5, %c0_6] : memref<1x16xf32, #tpu.memory_space<vmem>>, vector<1x16xf32>
    %8 = vector.broadcast %7 : vector<1x16xf32> to vector<512x16xf32>
    %9 = arith.addf %6, %8 : vector<512x16xf32>
    %cst_7 = arith.constant 0.000000e+00 : f32
    %10 = vector.broadcast %cst_7 : f32 to vector<512x16xf32>
    %11 = arith.maximumf %9, %10 : vector<512x16xf32>
    %12 = arith.truncf %11 : vector<512x16xf32> to vector<512x16xbf16>
    %c0_8 = arith.constant 0 : index
    %c0_9 = arith.constant 0 : index
    %13 = vector.load %arg5[%c0_8, %c0_9] : memref<512x16xbf16, #tpu.memory_space<vmem>>, vector<512x16xbf16>
    tpu.vector_store %arg5[%c0_8, %c0_9], %12 {strides = array<i32>} : memref<512x16xbf16, #tpu.memory_space<vmem>>, vector<512x16xbf16>,
    return
  }
  func.func @transform_0(%arg0: i32) -> (i32, i32) {
    %c0_i32 = arith.constant 0 : i32
    %c0_i32_0 = arith.constant 0 : i32
    return %arg0, %c0_i32 : i32, i32
  }
  func.func @transform_1(%arg0: i32) -> (i32, i32) {
    %c0_i32 = arith.constant 0 : i32
    %c0_i32_0 = arith.constant 0 : i32
    %c0_i32_1 = arith.constant 0 : i32
    return %c0_i32, %c0_i32_0 : i32, i32
  }
  func.func @transform_2(%arg0: i32) -> (i32, i32) {
    %c0_i32 = arith.constant 0 : i32
    %c0_i32_0 = arith.constant 0 : i32
    %c0_i32_1 = arith.constant 0 : i32
    return %c0_i32, %c0_i32_0 : i32, i32
  }
  func.func @transform_3(%arg0: i32) -> (i32, i32) {
    %c0_i32 = arith.constant 0 : i32
    %c0_i32_0 = arith.constant 0 : i32
    %c0_i32_1 = arith.constant 0 : i32
    return %c0_i32, %c0_i32_0 : i32, i32
  }
  func.func @transform_4(%arg0: i32) -> (i32, i32) {
    %c0_i32 = arith.constant 0 : i32
    %c0_i32_0 = arith.constant 0 : i32
    return %arg0, %c0_i32 : i32, i32
  }
}

module attributes {stable_mosaic.version = 11 : i64} {
  func.func @_gated_c_kernel(%arg0: i32, %arg1: i32, %arg2: memref<1x64x16xbf16, #tpu.memory_space<vmem>>, %arg3: memref<1x1x16xf32, #tpu.memory_space<vmem>>, %arg4: memref<16x2xbf16, #tpu.memory_space<vmem>>, %arg5: memref<1x2xf32, #tpu.memory_space<vmem>>, %arg6: memref<2x16xbf16, #tpu.memory_space<vmem>>, %arg7: memref<1x16xf32, #tpu.memory_space<vmem>>, %arg8: memref<16x16xbf16, #tpu.memory_space<vmem>>, %arg9: memref<1x16xf32, #tpu.memory_space<vmem>>, %arg10: memref<1x16xf32, #tpu.memory_space<vmem>>, %arg11: memref<1x64x16xbf16, #tpu.memory_space<vmem>>, %arg12: memref<1x16xbf16, #tpu.memory_space<vmem>>) attributes {dimension_semantics = [#tpu.dimension_semantics<parallel>, #tpu.dimension_semantics<arbitrary>], iteration_bounds = array<i64: 2, 1>, scalar_prefetch = 0 : i64, scratch_operands = 1 : i64, tpu.core_type = #tpu.core_type<tc>, window_params = [{transform_indices = @transform_0, window_bounds = array<i64: 1, 64, 16>}, {transform_indices = @transform_1, window_bounds = array<i64: 1, 1, 16>}, {pipeline_mode = #tpu.pipeline_mode<synchronous>, transform_indices = @transform_2, window_bounds = array<i64: 16, 2>}, {pipeline_mode = #tpu.pipeline_mode<synchronous>, transform_indices = @transform_3, window_bounds = array<i64: 1, 2>}, {pipeline_mode = #tpu.pipeline_mode<synchronous>, transform_indices = @transform_4, window_bounds = array<i64: 2, 16>}, {pipeline_mode = #tpu.pipeline_mode<synchronous>, transform_indices = @transform_5, window_bounds = array<i64: 1, 16>}, {pipeline_mode = #tpu.pipeline_mode<synchronous>, transform_indices = @transform_6, window_bounds = array<i64: 16, 16>}, {pipeline_mode = #tpu.pipeline_mode<synchronous>, transform_indices = @transform_7, window_bounds = array<i64: 1, 16>}, {pipeline_mode = #tpu.pipeline_mode<synchronous>, transform_indices = @transform_8, window_bounds = array<i64: 1, 16>}, {transform_indices = @transform_9, window_bounds = array<i64: 1, 64, 16>}]} {
    %c0_i32 = arith.constant 0 : i32
    %0 = arith.cmpi eq, %arg1, %c0_i32 : i32
    %1 = arith.extui %0 : i1 to i32
    %c0_i32_0 = arith.constant 0 : i32
    %2 = arith.cmpi ne, %1, %c0_i32_0 : i32
    scf.if %2 {
      %c0_14 = arith.constant 0 : index
      %c0_15 = arith.constant 0 : index
      %c0_16 = arith.constant 0 : index
      %20 = vector.load %arg3[%c0_14, %c0_15, %c0_16] : memref<1x1x16xf32, #tpu.memory_space<vmem>>, vector<1x1x16xf32>
      %21 = vector.shape_cast %20 : vector<1x1x16xf32> to vector<1x16xf32>
      %22 = arith.truncf %21 : vector<1x16xf32> to vector<1x16xbf16>
      %c0_17 = arith.constant 0 : index
      %c0_18 = arith.constant 0 : index
      %23 = vector.load %arg4[%c0_17, %c0_18] : memref<16x2xbf16, #tpu.memory_space<vmem>>, vector<16x2xbf16>
      %cst_19 = arith.constant dense<0.000000e+00> : vector<1x2xf32>
      %24 = tpu.matmul %22, %23, %cst_19 {dimension_numbers = #tpu.dot_dimension_numbers<[1], [0], [0], [1], [0, 0, 1, 1], [], []>} : vector<1x16xbf16>, vector<16x2xbf16>, vector<1x2xf32> -> vector<1x2xf32>
      %c0_20 = arith.constant 0 : index
      %c0_21 = arith.constant 0 : index
      %25 = vector.load %arg5[%c0_20, %c0_21] : memref<1x2xf32, #tpu.memory_space<vmem>>, vector<1x2xf32>
      %26 = arith.addf %24, %25 : vector<1x2xf32>
      %cst_22 = arith.constant 0.000000e+00 : f32
      %27 = vector.broadcast %cst_22 : f32 to vector<1x2xf32>
      %28 = arith.maximumf %26, %27 : vector<1x2xf32>
      %29 = arith.truncf %28 : vector<1x2xf32> to vector<1x2xbf16>
      %c0_23 = arith.constant 0 : index
      %c0_24 = arith.constant 0 : index
      %30 = vector.load %arg6[%c0_23, %c0_24] : memref<2x16xbf16, #tpu.memory_space<vmem>>, vector<2x16xbf16>
      %cst_25 = arith.constant dense<0.000000e+00> : vector<1x16xf32>
      %31 = tpu.matmul %29, %30, %cst_25 {dimension_numbers = #tpu.dot_dimension_numbers<[1], [0], [0], [1], [0, 0, 1, 1], [], []>} : vector<1x2xbf16>, vector<2x16xbf16>, vector<1x16xf32> -> vector<1x16xf32>
      %c0_26 = arith.constant 0 : index
      %c0_27 = arith.constant 0 : index
      %32 = vector.load %arg7[%c0_26, %c0_27] : memref<1x16xf32, #tpu.memory_space<vmem>>, vector<1x16xf32>
      %33 = arith.addf %31, %32 : vector<1x16xf32>
      %34 = arith.negf %33 : vector<1x16xf32>
      %35 = math.exp %34 : vector<1x16xf32>
      %cst_28 = arith.constant 1.000000e+00 : f32
      %36 = vector.broadcast %cst_28 : f32 to vector<1x16xf32>
      %37 = arith.addf %36, %35 : vector<1x16xf32>
      %38 = arith.divf %36, %37 : vector<1x16xf32>
      %39 = arith.truncf %38 : vector<1x16xf32> to vector<1x16xbf16>
      %c0_29 = arith.constant 0 : index
      %c0_30 = arith.constant 0 : index
      %40 = vector.load %arg12[%c0_29, %c0_30] : memref<1x16xbf16, #tpu.memory_space<vmem>>, vector<1x16xbf16>
      tpu.vector_store %arg12[%c0_29, %c0_30], %39 {strides = array<i32>} : memref<1x16xbf16, #tpu.memory_space<vmem>>, vector<1x16xbf16>,
    } else {
    }
    %c0 = arith.constant 0 : index
    %c0_1 = arith.constant 0 : index
    %c0_2 = arith.constant 0 : index
    %3 = vector.load %arg2[%c0, %c0_1, %c0_2] : memref<1x64x16xbf16, #tpu.memory_space<vmem>>, vector<1x64x16xbf16>
    %4 = vector.shape_cast %3 : vector<1x64x16xbf16> to vector<64x16xbf16>
    %c0_3 = arith.constant 0 : index
    %c0_4 = arith.constant 0 : index
    %5 = vector.load %arg12[%c0_3, %c0_4] : memref<1x16xbf16, #tpu.memory_space<vmem>>, vector<1x16xbf16>
    %6 = vector.broadcast %5 : vector<1x16xbf16> to vector<64x16xbf16>
    %7 = arith.mulf %4, %6 : vector<64x16xbf16>
    %c0_5 = arith.constant 0 : index
    %c0_6 = arith.constant 0 : index
    %8 = vector.load %arg8[%c0_5, %c0_6] : memref<16x16xbf16, #tpu.memory_space<vmem>>, vector<16x16xbf16>
    %cst = arith.constant dense<0.000000e+00> : vector<64x16xf32>
    %9 = tpu.matmul %7, %8, %cst {dimension_numbers = #tpu.dot_dimension_numbers<[1], [0], [0], [1], [0, 0, 1, 1], [], []>} : vector<64x16xbf16>, vector<16x16xbf16>, vector<64x16xf32> -> vector<64x16xf32>
    %c0_7 = arith.constant 0 : index
    %c0_8 = arith.constant 0 : index
    %10 = vector.load %arg9[%c0_7, %c0_8] : memref<1x16xf32, #tpu.memory_space<vmem>>, vector<1x16xf32>
    %11 = vector.broadcast %10 : vector<1x16xf32> to vector<64x16xf32>
    %12 = arith.mulf %9, %11 : vector<64x16xf32>
    %c0_9 = arith.constant 0 : index
    %c0_10 = arith.constant 0 : index
    %13 = vector.load %arg10[%c0_9, %c0_10] : memref<1x16xf32, #tpu.memory_space<vmem>>, vector<1x16xf32>
    %14 = vector.broadcast %13 : vector<1x16xf32> to vector<64x16xf32>
    %15 = arith.addf %12, %14 : vector<64x16xf32>
    %16 = arith.truncf %15 : vector<64x16xf32> to vector<64x16xbf16>
    %c0_11 = arith.constant 0 : index
    %c0_12 = arith.constant 0 : index
    %c0_13 = arith.constant 0 : index
    %17 = vector.load %arg11[%c0_11, %c0_12, %c0_13] : memref<1x64x16xbf16, #tpu.memory_space<vmem>>, vector<1x64x16xbf16>
    %18 = vector.shape_cast %17 : vector<1x64x16xbf16> to vector<64x16xbf16>
    %19 = vector.shape_cast %16 : vector<64x16xbf16> to vector<1x64x16xbf16>
    tpu.vector_store %arg11[%c0_11, %c0_12, %c0_13], %19 {strides = array<i32>} : memref<1x64x16xbf16, #tpu.memory_space<vmem>>, vector<1x64x16xbf16>,
    return
  }
  func.func @transform_0(%arg0: i32, %arg1: i32) -> (i32, i32, i32) {
    %c0_i32 = arith.constant 0 : i32
    %c0_i32_0 = arith.constant 0 : i32
    return %arg0, %arg1, %c0_i32 : i32, i32, i32
  }
  func.func @transform_1(%arg0: i32, %arg1: i32) -> (i32, i32, i32) {
    %c0_i32 = arith.constant 0 : i32
    %c0_i32_0 = arith.constant 0 : i32
    %c0_i32_1 = arith.constant 0 : i32
    return %arg0, %c0_i32, %c0_i32_0 : i32, i32, i32
  }
  func.func @transform_2(%arg0: i32, %arg1: i32) -> (i32, i32) {
    %c0_i32 = arith.constant 0 : i32
    %c0_i32_0 = arith.constant 0 : i32
    %c0_i32_1 = arith.constant 0 : i32
    return %c0_i32, %c0_i32_0 : i32, i32
  }
  func.func @transform_3(%arg0: i32, %arg1: i32) -> (i32, i32) {
    %c0_i32 = arith.constant 0 : i32
    %c0_i32_0 = arith.constant 0 : i32
    %c0_i32_1 = arith.constant 0 : i32
    return %c0_i32, %c0_i32_0 : i32, i32
  }
  func.func @transform_4(%arg0: i32, %arg1: i32) -> (i32, i32) {
    %c0_i32 = arith.constant 0 : i32
    %c0_i32_0 = arith.constant 0 : i32
    %c0_i32_1 = arith.constant 0 : i32
    return %c0_i32, %c0_i32_0 : i32, i32
  }
  func.func @transform_5(%arg0: i32, %arg1: i32) -> (i32, i32) {
    %c0_i32 = arith.constant 0 : i32
    %c0_i32_0 = arith.constant 0 : i32
    %c0_i32_1 = arith.constant 0 : i32
    return %c0_i32, %c0_i32_0 : i32, i32
  }
  func.func @transform_6(%arg0: i32, %arg1: i32) -> (i32, i32) {
    %c0_i32 = arith.constant 0 : i32
    %c0_i32_0 = arith.constant 0 : i32
    %c0_i32_1 = arith.constant 0 : i32
    return %c0_i32, %c0_i32_0 : i32, i32
  }
  func.func @transform_7(%arg0: i32, %arg1: i32) -> (i32, i32) {
    %c0_i32 = arith.constant 0 : i32
    %c0_i32_0 = arith.constant 0 : i32
    %c0_i32_1 = arith.constant 0 : i32
    return %c0_i32, %c0_i32_0 : i32, i32
  }
  func.func @transform_8(%arg0: i32, %arg1: i32) -> (i32, i32) {
    %c0_i32 = arith.constant 0 : i32
    %c0_i32_0 = arith.constant 0 : i32
    %c0_i32_1 = arith.constant 0 : i32
    return %c0_i32, %c0_i32_0 : i32, i32
  }
  func.func @transform_9(%arg0: i32, %arg1: i32) -> (i32, i32, i32) {
    %c0_i32 = arith.constant 0 : i32
    %c0_i32_0 = arith.constant 0 : i32
    return %arg0, %arg1, %c0_i32 : i32, i32, i32
  }
}

module attributes {stable_mosaic.version = 11 : i64} {
  func.func @_grouped_conv3x3_kernel(%arg0: i32, %arg1: i32, %arg2: memref<1x4x5x9x16xbf16, #tpu.memory_space<vmem>>, %arg3: memref<2x72x8xbf16, #tpu.memory_space<vmem>>, %arg4: memref<1x16xf32, #tpu.memory_space<vmem>>, %arg5: memref<1x16xf32, #tpu.memory_space<vmem>>, %arg6: memref<1x4x8x16xbf16, #tpu.memory_space<vmem>>, %arg7: memref<1x1x16xf32, #tpu.memory_space<vmem>>) attributes {dimension_semantics = [#tpu.dimension_semantics<parallel>, #tpu.dimension_semantics<arbitrary>], iteration_bounds = array<i64: 2, 2>, scalar_prefetch = 0 : i64, scratch_operands = 0 : i64, tpu.core_type = #tpu.core_type<tc>, window_params = [{transform_indices = @transform_0, window_bounds = array<i64: 1, 4, 5, 9, 16>}, {pipeline_mode = #tpu.pipeline_mode<synchronous>, transform_indices = @transform_1, window_bounds = array<i64: 2, 72, 8>}, {pipeline_mode = #tpu.pipeline_mode<synchronous>, transform_indices = @transform_2, window_bounds = array<i64: 1, 16>}, {pipeline_mode = #tpu.pipeline_mode<synchronous>, transform_indices = @transform_3, window_bounds = array<i64: 1, 16>}, {transform_indices = @transform_4, window_bounds = array<i64: 1, 4, 8, 16>}, {transform_indices = @transform_5, window_bounds = array<i64: 1, 1, 16>}]} {
    %c0_i32 = arith.constant 0 : i32
    %0 = arith.cmpi eq, %arg1, %c0_i32 : i32
    %1 = arith.extui %0 : i1 to i32
    %c0_i32_0 = arith.constant 0 : i32
    %2 = arith.cmpi ne, %1, %c0_i32_0 : i32
    scf.if %2 {
      %cst_49 = arith.constant 0.000000e+00 : f32
      %115 = vector.broadcast %cst_49 : f32 to vector<1x1x16xf32>
      %c0_50 = arith.constant 0 : index
      %c0_51 = arith.constant 0 : index
      %c0_52 = arith.constant 0 : index
      %116 = vector.load %arg7[%c0_50, %c0_51, %c0_52] : memref<1x1x16xf32, #tpu.memory_space<vmem>>, vector<1x1x16xf32>
      tpu.vector_store %arg7[%c0_50, %c0_51, %c0_52], %115 {strides = array<i32>} : memref<1x1x16xf32, #tpu.memory_space<vmem>>, vector<1x1x16xf32>,
    } else {
    }
    %c0 = arith.constant 0 : index
    %c0_1 = arith.constant 0 : index
    %c0_2 = arith.constant 0 : index
    %c0_3 = arith.constant 0 : index
    %c0_4 = arith.constant 0 : index
    %3 = vector.load %arg2[%c0, %c0_1, %c0_2, %c0_3, %c0_4] : memref<1x4x5x9x16xbf16, #tpu.memory_space<vmem>>, vector<1x4x5x9x8xbf16>
    %4 = vector.shape_cast %3 : vector<1x4x5x9x8xbf16> to vector<4x5x9x8xbf16>
    %5 = vector.extract_strided_slice %4 {offsets = [0, 0, 0, 0], sizes = [1, 4, 8, 8], strides = [1, 1, 1, 1]} : vector<4x5x9x8xbf16> to vector<1x4x8x8xbf16>
    %6 = vector.shape_cast %5 : vector<1x4x8x8xbf16> to vector<4x8x8xbf16>
    %7 = vector.shape_cast %6 : vector<4x8x8xbf16> to vector<32x8xbf16>
    %8 = vector.extract_strided_slice %4 {offsets = [1, 0, 0, 0], sizes = [1, 4, 8, 8], strides = [1, 1, 1, 1]} : vector<4x5x9x8xbf16> to vector<1x4x8x8xbf16>
    %9 = vector.shape_cast %8 : vector<1x4x8x8xbf16> to vector<4x8x8xbf16>
    %10 = vector.shape_cast %9 : vector<4x8x8xbf16> to vector<32x8xbf16>
    %11 = vector.extract_strided_slice %4 {offsets = [0, 0, 1, 0], sizes = [1, 4, 8, 8], strides = [1, 1, 1, 1]} : vector<4x5x9x8xbf16> to vector<1x4x8x8xbf16>
    %12 = vector.shape_cast %11 : vector<1x4x8x8xbf16> to vector<4x8x8xbf16>
    %13 = vector.shape_cast %12 : vector<4x8x8xbf16> to vector<32x8xbf16>
    %14 = vector.extract_strided_slice %4 {offsets = [2, 0, 0, 0], sizes = [1, 4, 8, 8], strides = [1, 1, 1, 1]} : vector<4x5x9x8xbf16> to vector<1x4x8x8xbf16>
    %15 = vector.shape_cast %14 : vector<1x4x8x8xbf16> to vector<4x8x8xbf16>
    %16 = vector.shape_cast %15 : vector<4x8x8xbf16> to vector<32x8xbf16>
    %17 = vector.extract_strided_slice %4 {offsets = [3, 0, 0, 0], sizes = [1, 4, 8, 8], strides = [1, 1, 1, 1]} : vector<4x5x9x8xbf16> to vector<1x4x8x8xbf16>
    %18 = vector.shape_cast %17 : vector<1x4x8x8xbf16> to vector<4x8x8xbf16>
    %19 = vector.shape_cast %18 : vector<4x8x8xbf16> to vector<32x8xbf16>
    %20 = vector.extract_strided_slice %4 {offsets = [2, 0, 1, 0], sizes = [1, 4, 8, 8], strides = [1, 1, 1, 1]} : vector<4x5x9x8xbf16> to vector<1x4x8x8xbf16>
    %21 = vector.shape_cast %20 : vector<1x4x8x8xbf16> to vector<4x8x8xbf16>
    %22 = vector.shape_cast %21 : vector<4x8x8xbf16> to vector<32x8xbf16>
    %23 = vector.extract_strided_slice %4 {offsets = [0, 1, 0, 0], sizes = [1, 4, 8, 8], strides = [1, 1, 1, 1]} : vector<4x5x9x8xbf16> to vector<1x4x8x8xbf16>
    %24 = vector.shape_cast %23 : vector<1x4x8x8xbf16> to vector<4x8x8xbf16>
    %25 = vector.shape_cast %24 : vector<4x8x8xbf16> to vector<32x8xbf16>
    %26 = vector.extract_strided_slice %4 {offsets = [1, 1, 0, 0], sizes = [1, 4, 8, 8], strides = [1, 1, 1, 1]} : vector<4x5x9x8xbf16> to vector<1x4x8x8xbf16>
    %27 = vector.shape_cast %26 : vector<1x4x8x8xbf16> to vector<4x8x8xbf16>
    %28 = vector.shape_cast %27 : vector<4x8x8xbf16> to vector<32x8xbf16>
    %29 = vector.extract_strided_slice %4 {offsets = [0, 1, 1, 0], sizes = [1, 4, 8, 8], strides = [1, 1, 1, 1]} : vector<4x5x9x8xbf16> to vector<1x4x8x8xbf16>
    %30 = vector.shape_cast %29 : vector<1x4x8x8xbf16> to vector<4x8x8xbf16>
    %31 = vector.shape_cast %30 : vector<4x8x8xbf16> to vector<32x8xbf16>
    %32 = tpu.concatenate %7, %10, %13, %16, %19, %22, %25, %28, %31 in 1 : vector<32x8xbf16>, vector<32x8xbf16>, vector<32x8xbf16>, vector<32x8xbf16>, vector<32x8xbf16>, vector<32x8xbf16>, vector<32x8xbf16>, vector<32x8xbf16>, vector<32x8xbf16> -> vector<32x72xbf16>
    %c0_5 = arith.constant 0 : index
    %c0_6 = arith.constant 0 : index
    %c0_7 = arith.constant 0 : index
    %33 = vector.load %arg3[%c0_5, %c0_6, %c0_7] : memref<2x72x8xbf16, #tpu.memory_space<vmem>>, vector<1x72x8xbf16>
    %34 = vector.shape_cast %33 : vector<1x72x8xbf16> to vector<72x8xbf16>
    %cst = arith.constant dense<0.000000e+00> : vector<32x8xf32>
    %35 = tpu.matmul %32, %34, %cst {dimension_numbers = #tpu.dot_dimension_numbers<[1], [0], [0], [1], [0, 0, 1, 1], [], []>} : vector<32x72xbf16>, vector<72x8xbf16>, vector<32x8xf32> -> vector<32x8xf32>
    %c0_8 = arith.constant 0 : index
    %c0_9 = arith.constant 0 : index
    %36 = vector.load %arg4[%c0_8, %c0_9] : memref<1x16xf32, #tpu.memory_space<vmem>>, vector<1x8xf32>
    %c0_10 = arith.constant 0 : index
    %c0_11 = arith.constant 0 : index
    %37 = vector.load %arg5[%c0_10, %c0_11] : memref<1x16xf32, #tpu.memory_space<vmem>>, vector<1x8xf32>
    %38 = vector.broadcast %36 : vector<1x8xf32> to vector<32x8xf32>
    %39 = arith.mulf %35, %38 : vector<32x8xf32>
    %40 = vector.broadcast %37 : vector<1x8xf32> to vector<32x8xf32>
    %41 = arith.addf %39, %40 : vector<32x8xf32>
    %cst_12 = arith.constant 0.000000e+00 : f32
    %42 = vector.broadcast %cst_12 : f32 to vector<32x8xf32>
    %43 = arith.maximumf %41, %42 : vector<32x8xf32>
    %44 = vector.shape_cast %43 : vector<32x8xf32> to vector<4x8x8xf32>
    %45 = arith.truncf %44 : vector<4x8x8xf32> to vector<4x8x8xbf16>
    %c0_13 = arith.constant 0 : index
    %c0_14 = arith.constant 0 : index
    %c0_15 = arith.constant 0 : index
    %c0_16 = arith.constant 0 : index
    %46 = vector.load %arg6[%c0_13, %c0_14, %c0_15, %c0_16] : memref<1x4x8x16xbf16, #tpu.memory_space<vmem>>, vector<1x4x8x8xbf16>
    %47 = vector.shape_cast %46 : vector<1x4x8x8xbf16> to vector<4x8x8xbf16>
    %48 = vector.shape_cast %45 : vector<4x8x8xbf16> to vector<1x4x8x8xbf16>
    tpu.vector_store %arg6[%c0_13, %c0_14, %c0_15, %c0_16], %48 {strides = array<i32>} : memref<1x4x8x16xbf16, #tpu.memory_space<vmem>>, vector<1x4x8x8xbf16>,
    %c0_17 = arith.constant 0 : index
    %c0_18 = arith.constant 0 : index
    %c0_19 = arith.constant 0 : index
    %49 = vector.load %arg7[%c0_17, %c0_18, %c0_19] : memref<1x1x16xf32, #tpu.memory_space<vmem>>, vector<1x1x8xf32>
    %50 = vector.shape_cast %49 : vector<1x1x8xf32> to vector<1x8xf32>
    %cst_20 = arith.constant dense<0.000000e+00> : vector<8xf32>
    %51 = vector.multi_reduction <add>, %43, %cst_20 [0] : vector<32x8xf32> to vector<8xf32>
    %52 = vector.shape_cast %51 : vector<8xf32> to vector<1x8xf32>
    %cst_21 = arith.constant 1.562500e-02 : f32
    %53 = vector.broadcast %cst_21 : f32 to vector<1x8xf32>
    %54 = arith.mulf %52, %53 : vector<1x8xf32>
    %55 = arith.addf %50, %54 : vector<1x8xf32>
    %c0_22 = arith.constant 0 : index
    %c0_23 = arith.constant 0 : index
    %c0_24 = arith.constant 0 : index
    %56 = vector.load %arg7[%c0_22, %c0_23, %c0_24] : memref<1x1x16xf32, #tpu.memory_space<vmem>>, vector<1x1x8xf32>
    %57 = vector.shape_cast %56 : vector<1x1x8xf32> to vector<1x8xf32>
    %58 = vector.shape_cast %55 : vector<1x8xf32> to vector<1x1x8xf32>
    tpu.vector_store %arg7[%c0_22, %c0_23, %c0_24], %58 {strides = array<i32>} : memref<1x1x16xf32, #tpu.memory_space<vmem>>, vector<1x1x8xf32>,
    %c0_25 = arith.constant 0 : index
    %c0_26 = arith.constant 0 : index
    %c0_27 = arith.constant 0 : index
    %c0_28 = arith.constant 0 : index
    %c8 = arith.constant 8 : index
    %59 = vector.load %arg2[%c0_25, %c0_26, %c0_27, %c0_28, %c8] : memref<1x4x5x9x16xbf16, #tpu.memory_space<vmem>>, vector<1x4x5x9x8xbf16>
    %60 = vector.shape_cast %59 : vector<1x4x5x9x8xbf16> to vector<4x5x9x8xbf16>
    %61 = vector.extract_strided_slice %60 {offsets = [0, 0, 0, 0], sizes = [1, 4, 8, 8], strides = [1, 1, 1, 1]} : vector<4x5x9x8xbf16> to vector<1x4x8x8xbf16>
    %62 = vector.shape_cast %61 : vector<1x4x8x8xbf16> to vector<4x8x8xbf16>
    %63 = vector.shape_cast %62 : vector<4x8x8xbf16> to vector<32x8xbf16>
    %64 = vector.extract_strided_slice %60 {offsets = [1, 0, 0, 0], sizes = [1, 4, 8, 8], strides = [1, 1, 1, 1]} : vector<4x5x9x8xbf16> to vector<1x4x8x8xbf16>
    %65 = vector.shape_cast %64 : vector<1x4x8x8xbf16> to vector<4x8x8xbf16>
    %66 = vector.shape_cast %65 : vector<4x8x8xbf16> to vector<32x8xbf16>
    %67 = vector.extract_strided_slice %60 {offsets = [0, 0, 1, 0], sizes = [1, 4, 8, 8], strides = [1, 1, 1, 1]} : vector<4x5x9x8xbf16> to vector<1x4x8x8xbf16>
    %68 = vector.shape_cast %67 : vector<1x4x8x8xbf16> to vector<4x8x8xbf16>
    %69 = vector.shape_cast %68 : vector<4x8x8xbf16> to vector<32x8xbf16>
    %70 = vector.extract_strided_slice %60 {offsets = [2, 0, 0, 0], sizes = [1, 4, 8, 8], strides = [1, 1, 1, 1]} : vector<4x5x9x8xbf16> to vector<1x4x8x8xbf16>
    %71 = vector.shape_cast %70 : vector<1x4x8x8xbf16> to vector<4x8x8xbf16>
    %72 = vector.shape_cast %71 : vector<4x8x8xbf16> to vector<32x8xbf16>
    %73 = vector.extract_strided_slice %60 {offsets = [3, 0, 0, 0], sizes = [1, 4, 8, 8], strides = [1, 1, 1, 1]} : vector<4x5x9x8xbf16> to vector<1x4x8x8xbf16>
    %74 = vector.shape_cast %73 : vector<1x4x8x8xbf16> to vector<4x8x8xbf16>
    %75 = vector.shape_cast %74 : vector<4x8x8xbf16> to vector<32x8xbf16>
    %76 = vector.extract_strided_slice %60 {offsets = [2, 0, 1, 0], sizes = [1, 4, 8, 8], strides = [1, 1, 1, 1]} : vector<4x5x9x8xbf16> to vector<1x4x8x8xbf16>
    %77 = vector.shape_cast %76 : vector<1x4x8x8xbf16> to vector<4x8x8xbf16>
    %78 = vector.shape_cast %77 : vector<4x8x8xbf16> to vector<32x8xbf16>
    %79 = vector.extract_strided_slice %60 {offsets = [0, 1, 0, 0], sizes = [1, 4, 8, 8], strides = [1, 1, 1, 1]} : vector<4x5x9x8xbf16> to vector<1x4x8x8xbf16>
    %80 = vector.shape_cast %79 : vector<1x4x8x8xbf16> to vector<4x8x8xbf16>
    %81 = vector.shape_cast %80 : vector<4x8x8xbf16> to vector<32x8xbf16>
    %82 = vector.extract_strided_slice %60 {offsets = [1, 1, 0, 0], sizes = [1, 4, 8, 8], strides = [1, 1, 1, 1]} : vector<4x5x9x8xbf16> to vector<1x4x8x8xbf16>
    %83 = vector.shape_cast %82 : vector<1x4x8x8xbf16> to vector<4x8x8xbf16>
    %84 = vector.shape_cast %83 : vector<4x8x8xbf16> to vector<32x8xbf16>
    %85 = vector.extract_strided_slice %60 {offsets = [0, 1, 1, 0], sizes = [1, 4, 8, 8], strides = [1, 1, 1, 1]} : vector<4x5x9x8xbf16> to vector<1x4x8x8xbf16>
    %86 = vector.shape_cast %85 : vector<1x4x8x8xbf16> to vector<4x8x8xbf16>
    %87 = vector.shape_cast %86 : vector<4x8x8xbf16> to vector<32x8xbf16>
    %88 = tpu.concatenate %63, %66, %69, %72, %75, %78, %81, %84, %87 in 1 : vector<32x8xbf16>, vector<32x8xbf16>, vector<32x8xbf16>, vector<32x8xbf16>, vector<32x8xbf16>, vector<32x8xbf16>, vector<32x8xbf16>, vector<32x8xbf16>, vector<32x8xbf16> -> vector<32x72xbf16>
    %c1 = arith.constant 1 : index
    %c0_29 = arith.constant 0 : index
    %c0_30 = arith.constant 0 : index
    %89 = vector.load %arg3[%c1, %c0_29, %c0_30] : memref<2x72x8xbf16, #tpu.memory_space<vmem>>, vector<1x72x8xbf16>
    %90 = vector.shape_cast %89 : vector<1x72x8xbf16> to vector<72x8xbf16>
    %cst_31 = arith.constant dense<0.000000e+00> : vector<32x8xf32>
    %91 = tpu.matmul %88, %90, %cst_31 {dimension_numbers = #tpu.dot_dimension_numbers<[1], [0], [0], [1], [0, 0, 1, 1], [], []>} : vector<32x72xbf16>, vector<72x8xbf16>, vector<32x8xf32> -> vector<32x8xf32>
    %c0_32 = arith.constant 0 : index
    %c8_33 = arith.constant 8 : index
    %92 = vector.load %arg4[%c0_32, %c8_33] : memref<1x16xf32, #tpu.memory_space<vmem>>, vector<1x8xf32>
    %c0_34 = arith.constant 0 : index
    %c8_35 = arith.constant 8 : index
    %93 = vector.load %arg5[%c0_34, %c8_35] : memref<1x16xf32, #tpu.memory_space<vmem>>, vector<1x8xf32>
    %94 = vector.broadcast %92 : vector<1x8xf32> to vector<32x8xf32>
    %95 = arith.mulf %91, %94 : vector<32x8xf32>
    %96 = vector.broadcast %93 : vector<1x8xf32> to vector<32x8xf32>
    %97 = arith.addf %95, %96 : vector<32x8xf32>
    %cst_36 = arith.constant 0.000000e+00 : f32
    %98 = vector.broadcast %cst_36 : f32 to vector<32x8xf32>
    %99 = arith.maximumf %97, %98 : vector<32x8xf32>
    %100 = vector.shape_cast %99 : vector<32x8xf32> to vector<4x8x8xf32>
    %101 = arith.truncf %100 : vector<4x8x8xf32> to vector<4x8x8xbf16>
    %c0_37 = arith.constant 0 : index
    %c0_38 = arith.constant 0 : index
    %c0_39 = arith.constant 0 : index
    %c8_40 = arith.constant 8 : index
    %102 = vector.load %arg6[%c0_37, %c0_38, %c0_39, %c8_40] : memref<1x4x8x16xbf16, #tpu.memory_space<vmem>>, vector<1x4x8x8xbf16>
    %103 = vector.shape_cast %102 : vector<1x4x8x8xbf16> to vector<4x8x8xbf16>
    %104 = vector.shape_cast %101 : vector<4x8x8xbf16> to vector<1x4x8x8xbf16>
    tpu.vector_store %arg6[%c0_37, %c0_38, %c0_39, %c8_40], %104 {strides = array<i32>} : memref<1x4x8x16xbf16, #tpu.memory_space<vmem>>, vector<1x4x8x8xbf16>,
    %c0_41 = arith.constant 0 : index
    %c0_42 = arith.constant 0 : index
    %c8_43 = arith.constant 8 : index
    %105 = vector.load %arg7[%c0_41, %c0_42, %c8_43] : memref<1x1x16xf32, #tpu.memory_space<vmem>>, vector<1x1x8xf32>
    %106 = vector.shape_cast %105 : vector<1x1x8xf32> to vector<1x8xf32>
    %cst_44 = arith.constant dense<0.000000e+00> : vector<8xf32>
    %107 = vector.multi_reduction <add>, %99, %cst_44 [0] : vector<32x8xf32> to vector<8xf32>
    %108 = vector.shape_cast %107 : vector<8xf32> to vector<1x8xf32>
    %cst_45 = arith.constant 1.562500e-02 : f32
    %109 = vector.broadcast %cst_45 : f32 to vector<1x8xf32>
    %110 = arith.mulf %108, %109 : vector<1x8xf32>
    %111 = arith.addf %106, %110 : vector<1x8xf32>
    %c0_46 = arith.constant 0 : index
    %c0_47 = arith.constant 0 : index
    %c8_48 = arith.constant 8 : index
    %112 = vector.load %arg7[%c0_46, %c0_47, %c8_48] : memref<1x1x16xf32, #tpu.memory_space<vmem>>, vector<1x1x8xf32>
    %113 = vector.shape_cast %112 : vector<1x1x8xf32> to vector<1x8xf32>
    %114 = vector.shape_cast %111 : vector<1x8xf32> to vector<1x1x8xf32>
    tpu.vector_store %arg7[%c0_46, %c0_47, %c8_48], %114 {strides = array<i32>} : memref<1x1x16xf32, #tpu.memory_space<vmem>>, vector<1x1x8xf32>,
    return
  }
  func.func @transform_0(%arg0: i32, %arg1: i32) -> (i32, i32, i32, i32, i32) {
    %c2_i32 = arith.constant 2 : i32
    %0 = arith.muli %arg0, %c2_i32 : i32
    %1 = arith.addi %0, %arg1 : i32
    %c0_i32 = arith.constant 0 : i32
    %c0_i32_0 = arith.constant 0 : i32
    %c0_i32_1 = arith.constant 0 : i32
    %c0_i32_2 = arith.constant 0 : i32
    %c0_i32_3 = arith.constant 0 : i32
    return %1, %c0_i32, %c0_i32_0, %c0_i32_1, %c0_i32_2 : i32, i32, i32, i32, i32
  }
  func.func @transform_1(%arg0: i32, %arg1: i32) -> (i32, i32, i32) {
    %c0_i32 = arith.constant 0 : i32
    %c0_i32_0 = arith.constant 0 : i32
    %c0_i32_1 = arith.constant 0 : i32
    %c0_i32_2 = arith.constant 0 : i32
    return %c0_i32, %c0_i32_0, %c0_i32_1 : i32, i32, i32
  }
  func.func @transform_2(%arg0: i32, %arg1: i32) -> (i32, i32) {
    %c0_i32 = arith.constant 0 : i32
    %c0_i32_0 = arith.constant 0 : i32
    %c0_i32_1 = arith.constant 0 : i32
    return %c0_i32, %c0_i32_0 : i32, i32
  }
  func.func @transform_3(%arg0: i32, %arg1: i32) -> (i32, i32) {
    %c0_i32 = arith.constant 0 : i32
    %c0_i32_0 = arith.constant 0 : i32
    %c0_i32_1 = arith.constant 0 : i32
    return %c0_i32, %c0_i32_0 : i32, i32
  }
  func.func @transform_4(%arg0: i32, %arg1: i32) -> (i32, i32, i32, i32) {
    %c0_i32 = arith.constant 0 : i32
    %c0_i32_0 = arith.constant 0 : i32
    %c0_i32_1 = arith.constant 0 : i32
    return %arg0, %arg1, %c0_i32, %c0_i32_0 : i32, i32, i32, i32
  }
  func.func @transform_5(%arg0: i32, %arg1: i32) -> (i32, i32, i32) {
    %c0_i32 = arith.constant 0 : i32
    %c0_i32_0 = arith.constant 0 : i32
    %c0_i32_1 = arith.constant 0 : i32
    return %arg0, %c0_i32, %c0_i32_0 : i32, i32, i32
  }
}

</mosaic_0001>

<bundles_post_ra>
// kernel: bottleneck_transform_forward.3
= control target key start
LH: loop header
LB: loop body
LE: loop exit
PB: predicated region body
PF: predicated region fallthrough
CT: control target
= control target key end

     0   :  { %vm212_vm0 = vcmask 1043456   ;;  %vm115_vm1 = vcmask 64512   ;;  %vm967_vm2 = vcmask 125952   ;;  %s1947_s1 = inlined_call_operand.vmem [shape: bf16[8,16], index: 1, kind: input, shape index: {}]   ;;  %s1948_s0 = inlined_call_operand.vmem [shape: f32[512,8], index: 0, kind: input, shape index: {}]   ;;  %s1949_s2 = inlined_call_operand.vmem [shape: f32[1,16], index: 2, kind: input, shape index: {}]   ;;  %s1950_s3 = inlined_call_operand.vmem [shape: f32[1,16], index: 3, kind: input, shape index: {}]   ;;  %s1951_s4 = inlined_call_operand.vmem [shape: bf16[512,16], index: 4, kind: output, shape index: {}]  }
   0x1   :  { %v114_v0 = vld [vmem:[%s1947_s1] sm:$0xf]  ;;  %v19_v2 = vld [vmem:[%s1948_s0 + $0x8] sm:$0xff]  ;;  %v20_v7 = vld [vmem:[%s1948_s0 + $0x10] sm:$0xff] }
   0x2   :  { %v18_v1 = vld [vmem:[%s1948_s0] sm:$0xff]  ;;  %1299 = vmatprep.subr.msk.bf16.mxu0 %vm212_vm0, %v114_v0  ;;  %1300 = vmatprep.subr.msk.bf16.mxu1 %vm212_vm0, %v114_v0  ;;  %v214_v3 = vsel %vm212_vm0, %v114_v0, 0  ;;  %v51_v6 = vld [vmem:[%s1948_s0 + $0x108] sm:$0xff]  ;;  %v21_v9 = vld [vmem:[%s1948_s0 + $0x18] sm:$0xff] }
   0x3   :  { %v82_v4 = vpack.c.bf16 %v19_v2, %v18_v1  ;;  %v50_v5 = vld [vmem:[%s1948_s0 + $0x100] sm:$0xff]  ;;  %1232 = vmatpush3.bf16.msra.mxu0 %v214_v3  ;;  %1298 = vmatpush3.bf16.msra.mxu1 %v214_v3  ;;  %v52_v10 = vld [vmem:[%s1948_s0 + $0x110] sm:$0xff]  ;;  %v53_v11 = vld [vmem:[%s1948_s0 + $0x118] sm:$0xff]  ;;  %v83_v12 = vpack.c.bf16 %v21_v9, %v20_v7 }
   0x4   :  { %v98_v8 = vpack.c.bf16 %v51_v6, %v50_v5  ;;  %v99_v13 = vpack.c.bf16 %v53_v11, %v52_v10  ;;  %v22_v14 = vld [vmem:[%s1948_s0 + $0x20] sm:$0xff]  ;;  %v23_v15 = vld [vmem:[%s1948_s0 + $0x28] sm:$0xff]  ;;  %v24_v20 = vld [vmem:[%s1948_s0 + $0x30] sm:$0xff] }
   0x5   :  { %1233 = vmatprep.mubr.msk.bf16.mxu0 %vm115_vm1, %v82_v4  ;;  %v54_v16 = vld [vmem:[%s1948_s0 + $0x120] sm:$0xff]  ;;  %v84_v17 = vpack.c.bf16 %v23_v15, %v22_v14  ;;  %v55_v18 = vld [vmem:[%s1948_s0 + $0x128] sm:$0xff]  ;;  %v25_v21 = vld [vmem:[%s1948_s0 + $0x38] sm:$0xff] }
   0x6   :  { %1265 = vmatprep.mubr.msk.bf16.mxu1 %vm115_vm1, %v98_v8  ;;  %1234 = vmatmul.mubr.msk.bf16.vlgmr.msra.gmra.mrb[0].mxu0 %vm115_vm1, %v83_v12  ;;  %v100_v19 = vpack.c.bf16 %v55_v18, %v54_v16  ;;  %v56_v22 = vld [vmem:[%s1948_s0 + $0x130] sm:$0xff]  ;;  %v57_v23 = vld [vmem:[%s1948_s0 + $0x138] sm:$0xff]  ;;  %v26_v24 = vld [vmem:[%s1948_s0 + $0x40] sm:$0xff]  ;;  %v85_v28 = vpack.c.bf16 %v25_v21, %v24_v20 }
   0x7   :  { %1266 = vmatmul.mubr.msk.bf16.vlgmr.msra.gmra.mrb[0].mxu1 %vm115_vm1, %v99_v13  ;;  %1237 = vmatprep.mubr.msk.bf16.mxu0 %vm115_vm1, %v84_v17  ;;  %v27_v25 = vld [vmem:[%s1948_s0 + $0x48] sm:$0xff]  ;;  %v58_v26 = vld [vmem:[%s1948_s0 + $0x140] sm:$0xff]  ;;  %v101_v29 = vpack.c.bf16 %v57_v23, %v56_v22  ;;  %v28_v32 = vld [vmem:[%s1948_s0 + $0x50] sm:$0xff] }
   0x8   :  { %1269 = vmatprep.mubr.msk.bf16.mxu1 %vm115_vm1, %v100_v19  ;;  %v59_v27 = vld [vmem:[%s1948_s0 + $0x148] sm:$0xff]  ;;  %v86_v30 = vpack.c.bf16 %v27_v25, %v26_v24  ;;  %v29_v33 = vld [vmem:[%s1948_s0 + $0x58] sm:$0xff]  ;;  %v60_v34 = vld [vmem:[%s1948_s0 + $0x150] sm:$0xff] }
   0x9   :  { %v102_v31 = vpack.c.bf16 %v59_v27, %v58_v26  ;;  %v61_v35 = vld [vmem:[%s1948_s0 + $0x158] sm:$0xff]  ;;  %v30_v36 = vld [vmem:[%s1948_s0 + $0x60] sm:$0xff]  ;;  %v31_v37 = vld [vmem:[%s1948_s0 + $0x68] sm:$0xff]  ;;  %v87_v40 = vpack.c.bf16 %v29_v33, %v28_v32 }
   0xa   :  { %v62_v38 = vld [vmem:[%s1948_s0 + $0x160] sm:$0xff]  ;;  %v63_v39 = vld [vmem:[%s1948_s0 + $0x168] sm:$0xff]  ;;  %v103_v41 = vpack.c.bf16 %v61_v35, %v60_v34  ;;  %v88_v42 = vpack.c.bf16 %v31_v37, %v30_v36  ;;  %v32_v44 = vld [vmem:[%s1948_s0 + $0x70] sm:$0xff] }
   0xb   :  { %v104_v43 = vpack.c.bf16 %v63_v39, %v62_v38  ;;  %v33_v45 = vld [vmem:[%s1948_s0 + $0x78] sm:$0xff]  ;;  %v64_v46 = vld [vmem:[%s1948_s0 + $0x170] sm:$0xff]  ;;  %v34_v48 = vld [vmem:[%s1948_s0 + $0x80] sm:$0xff] }
   0xc   :  { %v65_v47 = vld [vmem:[%s1948_s0 + $0x178] sm:$0xff]  ;;  %v35_v49 = vld [vmem:[%s1948_s0 + $0x88] sm:$0xff]  ;;  %v66_v50 = vld [vmem:[%s1948_s0 + $0x180] sm:$0xff]  ;;  %v89_v52 = vpack.c.bf16 %v33_v45, %v32_v44 }
   0xd   :  { %v67_v51 = vld [vmem:[%s1948_s0 + $0x188] sm:$0xff]  ;;  %v105_v53 = vpack.c.bf16 %v65_v47, %v64_v46  ;;  %v90_v54 = vpack.c.bf16 %v35_v49, %v34_v48  ;;  %v36_v56 = vld [vmem:[%s1948_s0 + $0x90] sm:$0xff]  ;;  %v37_v57 = vld [vmem:[%s1948_s0 + $0x98] sm:$0xff] }
   0xe   :  { %1238 = vmatmul.mubr.msk.bf16.gmra.mrb[4].mxu0 %vm115_vm1, %v85_v28  ;;  %v106_v55 = vpack.c.bf16 %v67_v51, %v66_v50  ;;  %v68_v58 = vld [vmem:[%s1948_s0 + $0x190] sm:$0xff]  ;;  %v69_v59 = vld [vmem:[%s1948_s0 + $0x198] sm:$0xff]  ;;  %v38_v60 = vld [vmem:[%s1948_s0 + $0xa0] sm:$0xff]  ;;  %v91_v0 = vpack.c.bf16 %v37_v57, %v36_v56 }
   0xf   :  { %1270 = vmatmul.mubr.msk.bf16.gmra.mrb[4].mxu1 %vm115_vm1, %v101_v29  ;;  %1241 = vmatprep.mubr.msk.bf16.mxu0 %vm115_vm1, %v86_v30  ;;  %v39_v61 = vld [vmem:[%s1948_s0 + $0xa8] sm:$0xff]  ;;  %v70_v62 = vld [vmem:[%s1948_s0 + $0x1a0] sm:$0xff]  ;;  %v107_v1 = vpack.c.bf16 %v69_v59, %v68_v58  ;;  %v40_v4 = vld [vmem:[%s1948_s0 + $0xb0] sm:$0xff] }
  0x10   :  { %1273 = vmatprep.mubr.msk.bf16.mxu1 %vm115_vm1, %v102_v31  ;;  %v71_v63 = vld [vmem:[%s1948_s0 + $0x1a8] sm:$0xff]  ;;  %v92_v2 = vpack.c.bf16 %v39_v61, %v38_v60  ;;  %v41_v5 = vld [vmem:[%s1948_s0 + $0xb8] sm:$0xff]  ;;  %v72_v6 = vld [vmem:[%s1948_s0 + $0x1b0] sm:$0xff] }
  0x11   :  { %v108_v3 = vpack.c.bf16 %v71_v63, %v70_v62  ;;  %v73_v7 = vld [vmem:[%s1948_s0 + $0x1b8] sm:$0xff]  ;;  %v42_v8 = vld [vmem:[%s1948_s0 + $0xc0] sm:$0xff]  ;;  %v43_v9 = vld [vmem:[%s1948_s0 + $0xc8] sm:$0xff]  ;;  %v93_v12 = vpack.c.bf16 %v41_v5, %v40_v4 }
  0x12   :  { %v74_v10 = vld [vmem:[%s1948_s0 + $0x1c0] sm:$0xff]  ;;  %v75_v11 = vld [vmem:[%s1948_s0 + $0x1c8] sm:$0xff]  ;;  %v109_v13 = vpack.c.bf16 %v73_v7, %v72_v6  ;;  %v94_v14 = vpack.c.bf16 %v43_v9, %v42_v8  ;;  %v44_v16 = vld [vmem:[%s1948_s0 + $0xd0] sm:$0xff] }
  0x13   :  { %v110_v15 = vpack.c.bf16 %v75_v11, %v74_v10  ;;  %v45_v17 = vld [vmem:[%s1948_s0 + $0xd8] sm:$0xff]  ;;  %v76_v18 = vld [vmem:[%s1948_s0 + $0x1d0] sm:$0xff]  ;;  %v46_v20 = vld [vmem:[%s1948_s0 + $0xe0] sm:$0xff] }
  0x14   :  { %v77_v19 = vld [vmem:[%s1948_s0 + $0x1d8] sm:$0xff]  ;;  %v47_v21 = vld [vmem:[%s1948_s0 + $0xe8] sm:$0xff]  ;;  %v78_v22 = vld [vmem:[%s1948_s0 + $0x1e0] sm:$0xff]  ;;  %v95_v24 = vpack.c.bf16 %v45_v17, %v44_v16 }
  0x15   :  { %v79_v23 = vld [vmem:[%s1948_s0 + $0x1e8] sm:$0xff]  ;;  %v111_v25 = vpack.c.bf16 %v77_v19, %v76_v18  ;;  %v96_v26 = vpack.c.bf16 %v47_v21, %v46_v20  ;;  %v48_v28 = vld [vmem:[%s1948_s0 + $0xf0] sm:$0xff]  ;;  %v49_v29 = vld [vmem:[%s1948_s0 + $0xf8] sm:$0xff] }
  0x16   :  { %1242 = vmatmul.mubr.msk.bf16.gmra.mrb[8].mxu0 %vm115_vm1, %v87_v40  ;;  %v112_v27 = vpack.c.bf16 %v79_v23, %v78_v22  ;;  %v80_v30 = vld [vmem:[%s1948_s0 + $0x1f0] sm:$0xff]  ;;  %v81_v31 = vld [vmem:[%s1948_s0 + $0x1f8] sm:$0xff]  ;;  %v97_v32 = vpack.c.bf16 %v49_v29, %v48_v28  ;;  %v1556_v34 = vld [vmem:[%s1949_s2] ss:$0 sm:$0xff] }
  0x17   :  { %1274 = vmatmul.mubr.msk.bf16.gmra.mrb[8].mxu1 %vm115_vm1, %v103_v41  ;;  %1245 = vmatprep.mubr.msk.bf16.mxu0 %vm115_vm1, %v88_v42  ;;  %v113_v33 = vpack.c.bf16 %v81_v31, %v80_v30  ;;  %v1561_v36 = vld [vmem:[%s1950_s3] ss:$0 sm:$0xff] }
  0x18   :  { %1277 = vmatprep.mubr.msk.bf16.mxu1 %vm115_vm1, %v104_v43 }
  0x1e   :  { %1246 = vmatmul.mubr.msk.bf16.gmra.mrb[12].mxu0 %vm115_vm1, %v89_v52 }
  0x1f   :  { %1278 = vmatmul.mubr.msk.bf16.gmra.mrb[12].mxu1 %vm115_vm1, %v105_v53  ;;  %1249 = vmatprep.mubr.msk.bf16.mxu0 %vm115_vm1, %v90_v54 }
  0x20   :  { %1281 = vmatprep.mubr.msk.bf16.mxu1 %vm115_vm1, %v106_v55 }
  0x26   :  { %1250 = vmatmul.mubr.msk.bf16.gmra.mrb[16].mxu0 %vm115_vm1, %v91_v0 }
  0x27   :  { %1282 = vmatmul.mubr.msk.bf16.gmra.mrb[16].mxu1 %vm115_vm1, %v107_v1  ;;  %1253 = vmatprep.mubr.msk.bf16.mxu0 %vm115_vm1, %v92_v2 }
  0x28   :  { %1285 = vmatprep.mubr.msk.bf16.mxu1 %vm115_vm1, %v108_v3 }
  0x2e   :  { %1254 = vmatmul.mubr.msk.bf16.gmra.mrb[20].mxu0 %vm115_vm1, %v93_v12 }
  0x2f   :  { %1286 = vmatmul.mubr.msk.bf16.gmra.mrb[20].mxu1 %vm115_vm1, %v109_v13  ;;  %1257 = vmatprep.mubr.msk.bf16.mxu0 %vm115_vm1, %v94_v14 }
  0x30   :  { %1289 = vmatprep.mubr.msk.bf16.mxu1 %vm115_vm1, %v110_v15 }
  0x36   :  { %1258 = vmatmul.mubr.msk.bf16.gmra.mrb[24].mxu0 %vm115_vm1, %v95_v24 }
  0x37   :  { %1290 = vmatmul.mubr.msk.bf16.gmra.mrb[24].mxu1 %vm115_vm1, %v111_v25  ;;  %1261 = vmatprep.mubr.msk.bf16.mxu0 %vm115_vm1, %v96_v26 }
  0x38   :  { %1293 = vmatprep.mubr.msk.bf16.mxu1 %vm115_vm1, %v112_v27 }
  0x3e   :  { %1262 = vmatmul.mubr.msk.bf16.gmra.mrb[28].mxu0 %vm115_vm1, %v97_v32 }
  0x3f   :  { %1294 = vmatmul.mubr.msk.bf16.gmra.mrb[28].mxu1 %vm115_vm1, %v113_v33 }
  0xd9   :  { %v1235_v35 = vpop.f32.mrb[0].mxu0 }
  0xda   :  { %v1267_v37 = vpop.f32.mrb[0].mxu1  ;;  %v514_v38 = vmul.f32 %v1235_v35, %v1556_v34  ;;  %v250_v40 = vpop.f32.mrb[1].mxu0 }
  0xdb   :  { %v546_v39 = vmul.f32 %v1267_v37, %v1556_v34  ;;  %v378_v41 = vpop.f32.mrb[1].mxu1  ;;  %v512_v42 = vmul.f32 %v1556_v34, %v250_v40  ;;  %v1236_v44 = vpop.f32.mrb[2].mxu0 }
  0xdc   :  { %v544_v43 = vmul.f32 %v1556_v34, %v378_v41  ;;  %v1268_v45 = vpop.f32.mrb[2].mxu1  ;;  %v585_v46 = vadd.f32 %v1561_v36, %v514_v38  ;;  %v515_v48 = vmul.f32 %v1236_v44, %v1556_v34  ;;  %v253_v50 = vpop.f32.mrb[3].mxu0 }
  0xdd   :  { %v617_v47 = vadd.f32 %v1561_v36, %v546_v39  ;;  %v547_v49 = vmul.f32 %v1268_v45, %v1556_v34  ;;  %v381_v51 = vpop.f32.mrb[3].mxu1  ;;  %v583_v52 = vadd.f32 %v1561_v36, %v512_v42  ;;  %v513_v54 = vmul.f32 %v1556_v34, %v253_v50 }
  0xde   :  { %v615_v53 = vadd.f32 %v1561_v36, %v544_v43  ;;  %v545_v55 = vmul.f32 %v1556_v34, %v381_v51  ;;  %v649_v56 = vmax.f32 %v585_v46, 0.0  ;;  %v586_v58 = vadd.f32 %v1561_v36, %v515_v48 }
  0xdf   :  { %v681_v57 = vmax.f32 %v617_v47, 0.0  ;;  %v618_v59 = vadd.f32 %v1561_v36, %v547_v49  ;;  %v647_v60 = vmax.f32 %v583_v52, 0.0  ;;  %v584_v62 = vadd.f32 %v1561_v36, %v513_v54 }
  0xe0   :  { %v679_v61 = vmax.f32 %v615_v53, 0.0  ;;  %v616_v63 = vadd.f32 %v1561_v36, %v545_v55  ;;  %v1136_v0 = vpack.c.bf16 %v649_v56, %v649_v56  ;;  %v650_v2 = vmax.f32 %v586_v58, 0.0 }
  0xe1   :  { %v1168_v1 = vpack.c.bf16 %v681_v57, %v681_v57  ;;  %v682_v3 = vmax.f32 %v618_v59, 0.0  ;;  %v1134_v4 = vpack.c.bf16 %v647_v60, %v647_v60  ;;  %v648_v6 = vmax.f32 %v584_v62, 0.0  ;;  %v1239_v8 = vpop.f32.mrb[4].mxu0 }
  0xe2   :  { %v1166_v5 = vpack.c.bf16 %v679_v61, %v679_v61  ;;  %v680_v7 = vmax.f32 %v616_v63, 0.0  ;;  %v1271_v9 = vpop.f32.mrb[4].mxu1  ;;  %970 = vst.msk [vmem:[%s1951_s4 + $0x8] sm:$0xf] %vm967_vm2, %v1136_v0  ;;  %v1137_v10 = vpack.c.bf16 %v650_v2, %v650_v2  ;;  %v518_v12 = vmul.f32 %v1239_v8, %v1556_v34  ;;  %v266_v14 = vpop.f32.mrb[5].mxu0 }
  0xe3   :  { %1002 = vst.msk [vmem:[%s1951_s4 + $0x88] sm:$0xf] %vm967_vm2, %v1168_v1  ;;  %v1169_v11 = vpack.c.bf16 %v682_v3, %v682_v3  ;;  %v550_v13 = vmul.f32 %v1271_v9, %v1556_v34  ;;  %v394_v15 = vpop.f32.mrb[5].mxu1  ;;  %968 = vst.msk [vmem:[%s1951_s4] sm:$0xf] %vm967_vm2, %v1134_v4  ;;  %v1135_v16 = vpack.c.bf16 %v648_v6, %v648_v6  ;;  %v1240_v20 = vpop.f32.mrb[6].mxu0 }
  0xe4   :  { %1000 = vst.msk [vmem:[%s1951_s4 + $0x80] sm:$0xf] %vm967_vm2, %v1166_v5  ;;  %v1167_v17 = vpack.c.bf16 %v680_v7, %v680_v7  ;;  %v516_v18 = vmul.f32 %v1556_v34, %v266_v14  ;;  %v548_v19 = vmul.f32 %v1556_v34, %v394_v15  ;;  %v1272_v21 = vpop.f32.mrb[6].mxu1  ;;  %971 = vst.msk [vmem:[%s1951_s4 + $0xc] sm:$0xf] %vm967_vm2, %v1137_v10  ;;  %v269_v26 = vpop.f32.mrb[7].mxu0 }
  0xe5   :  { %1003 = vst.msk [vmem:[%s1951_s4 + $0x8c] sm:$0xf] %vm967_vm2, %v1169_v11  ;;  %v589_v22 = vadd.f32 %v1561_v36, %v518_v12  ;;  %v621_v23 = vadd.f32 %v1561_v36, %v550_v13  ;;  %v519_v24 = vmul.f32 %v1240_v20, %v1556_v34  ;;  %v551_v25 = vmul.f32 %v1272_v21, %v1556_v34  ;;  %v397_v27 = vpop.f32.mrb[7].mxu1 }
  0xe6   :  { %969 = vst.msk [vmem:[%s1951_s4 + $0x4] sm:$0xf] %vm967_vm2, %v1135_v16  ;;  %1001 = vst.msk [vmem:[%s1951_s4 + $0x84] sm:$0xf] %vm967_vm2, %v1167_v17  ;;  %v587_v28 = vadd.f32 %v1561_v36, %v516_v18  ;;  %v619_v29 = vadd.f32 %v1561_v36, %v548_v19  ;;  %v517_v30 = vmul.f32 %v1556_v34, %v269_v26 }
  0xe7   :  { %v549_v31 = vmul.f32 %v1556_v34, %v397_v27  ;;  %v653_v32 = vmax.f32 %v589_v22, 0.0  ;;  %v685_v33 = vmax.f32 %v621_v23, 0.0  ;;  %v590_v35 = vadd.f32 %v1561_v36, %v519_v24 }
  0xe8   :  { %v622_v37 = vadd.f32 %v1561_v36, %v551_v25  ;;  %v651_v38 = vmax.f32 %v587_v28, 0.0  ;;  %v683_v39 = vmax.f32 %v619_v29, 0.0  ;;  %v588_v40 = vadd.f32 %v1561_v36, %v517_v30 }
  0xe9   :  { %v620_v41 = vadd.f32 %v1561_v36, %v549_v31  ;;  %v1140_v42 = vpack.c.bf16 %v653_v32, %v653_v32  ;;  %v1172_v43 = vpack.c.bf16 %v685_v33, %v685_v33  ;;  %v654_v44 = vmax.f32 %v590_v35, 0.0  ;;  %v1243_v50 = vpop.f32.mrb[8].mxu0 }
  0xea   :  { %v686_v45 = vmax.f32 %v622_v37, 0.0  ;;  %v1138_v46 = vpack.c.bf16 %v651_v38, %v651_v38  ;;  %v1170_v47 = vpack.c.bf16 %v683_v39, %v683_v39  ;;  %v652_v48 = vmax.f32 %v588_v40, 0.0  ;;  %v1275_v51 = vpop.f32.mrb[8].mxu1  ;;  %v282_v56 = vpop.f32.mrb[9].mxu0 }
  0xeb   :  { %v684_v49 = vmax.f32 %v620_v41, 0.0  ;;  %974 = vst.msk [vmem:[%s1951_s4 + $0x18] sm:$0xf] %vm967_vm2, %v1140_v42  ;;  %1006 = vst.msk [vmem:[%s1951_s4 + $0x98] sm:$0xf] %vm967_vm2, %v1172_v43  ;;  %v1141_v52 = vpack.c.bf16 %v654_v44, %v654_v44  ;;  %v522_v54 = vmul.f32 %v1243_v50, %v1556_v34  ;;  %v554_v55 = vmul.f32 %v1275_v51, %v1556_v34  ;;  %v410_v57 = vpop.f32.mrb[9].mxu1 }
  0xec   :  { %v1173_v53 = vpack.c.bf16 %v686_v45, %v686_v45  ;;  %972 = vst.msk [vmem:[%s1951_s4 + $0x10] sm:$0xf] %vm967_vm2, %v1138_v46  ;;  %1004 = vst.msk [vmem:[%s1951_s4 + $0x90] sm:$0xf] %vm967_vm2, %v1170_v47  ;;  %v1139_v58 = vpack.c.bf16 %v652_v48, %v652_v48  ;;  %v520_v60 = vmul.f32 %v1556_v34, %v282_v56  ;;  %v1244_v62 = vpop.f32.mrb[10].mxu0  ;;  %v1276_v63 = vpop.f32.mrb[10].mxu1 }
  0xed   :  { %v1171_v59 = vpack.c.bf16 %v684_v49, %v684_v49  ;;  %v552_v61 = vmul.f32 %v1556_v34, %v410_v57  ;;  %975 = vst.msk [vmem:[%s1951_s4 + $0x1c] sm:$0xf] %vm967_vm2, %v1141_v52  ;;  %v593_v0 = vadd.f32 %v1561_v36, %v522_v54  ;;  %v625_v1 = vadd.f32 %v1561_v36, %v554_v55  ;;  %v285_v4 = vpop.f32.mrb[11].mxu0  ;;  %v413_v5 = vpop.f32.mrb[11].mxu1 }
  0xee   :  { %1007 = vst.msk [vmem:[%s1951_s4 + $0x9c] sm:$0xf] %vm967_vm2, %v1173_v53  ;;  %v523_v2 = vmul.f32 %v1244_v62, %v1556_v34  ;;  %v555_v3 = vmul.f32 %v1276_v63, %v1556_v34  ;;  %973 = vst.msk [vmem:[%s1951_s4 + $0x14] sm:$0xf] %vm967_vm2, %v1139_v58  ;;  %v591_v6 = vadd.f32 %v1561_v36, %v520_v60 }
  0xef   :  { %1005 = vst.msk [vmem:[%s1951_s4 + $0x94] sm:$0xf] %vm967_vm2, %v1171_v59  ;;  %v623_v7 = vadd.f32 %v1561_v36, %v552_v61  ;;  %v521_v8 = vmul.f32 %v1556_v34, %v285_v4  ;;  %v553_v9 = vmul.f32 %v1556_v34, %v413_v5  ;;  %v657_v10 = vmax.f32 %v593_v0, 0.0 }
  0xf0   :  { %v689_v11 = vmax.f32 %v625_v1, 0.0  ;;  %v594_v12 = vadd.f32 %v1561_v36, %v523_v2  ;;  %v626_v13 = vadd.f32 %v1561_v36, %v555_v3  ;;  %v655_v14 = vmax.f32 %v591_v6, 0.0 }
  0xf1   :  { %v687_v15 = vmax.f32 %v623_v7, 0.0  ;;  %v592_v16 = vadd.f32 %v1561_v36, %v521_v8  ;;  %v624_v17 = vadd.f32 %v1561_v36, %v553_v9  ;;  %v1144_v18 = vpack.c.bf16 %v657_v10, %v657_v10  ;;  %v1247_v26 = vpop.f32.mrb[12].mxu0 }
  0xf2   :  { %v1176_v19 = vpack.c.bf16 %v689_v11, %v689_v11  ;;  %v658_v20 = vmax.f32 %v594_v12, 0.0  ;;  %v690_v21 = vmax.f32 %v626_v13, 0.0  ;;  %v1142_v22 = vpack.c.bf16 %v655_v14, %v655_v14  ;;  %v1279_v27 = vpop.f32.mrb[12].mxu1  ;;  %v298_v32 = vpop.f32.mrb[13].mxu0 }
  0xf3   :  { %v1174_v23 = vpack.c.bf16 %v687_v15, %v687_v15  ;;  %v656_v24 = vmax.f32 %v592_v16, 0.0  ;;  %v688_v25 = vmax.f32 %v624_v17, 0.0  ;;  %978 = vst.msk [vmem:[%s1951_s4 + $0x28] sm:$0xf] %vm967_vm2, %v1144_v18  ;;  %v526_v30 = vmul.f32 %v1247_v26, %v1556_v34  ;;  %v426_v33 = vpop.f32.mrb[13].mxu1  ;;  %v1248_v40 = vpop.f32.mrb[14].mxu0 }
  0xf4   :  { %1010 = vst.msk [vmem:[%s1951_s4 + $0xa8] sm:$0xf] %vm967_vm2, %v1176_v19  ;;  %v1145_v28 = vpack.c.bf16 %v658_v20, %v658_v20  ;;  %v1177_v29 = vpack.c.bf16 %v690_v21, %v690_v21  ;;  %v558_v31 = vmul.f32 %v1279_v27, %v1556_v34  ;;  %976 = vst.msk [vmem:[%s1951_s4 + $0x20] sm:$0xf] %vm967_vm2, %v1142_v22  ;;  %v1280_v41 = vpop.f32.mrb[14].mxu1  ;;  %v301_v46 = vpop.f32.mrb[15].mxu0 }
  0xf5   :  { %1008 = vst.msk [vmem:[%s1951_s4 + $0xa0] sm:$0xf] %vm967_vm2, %v1174_v23  ;;  %v1143_v35 = vpack.c.bf16 %v656_v24, %v656_v24  ;;  %v1175_v37 = vpack.c.bf16 %v688_v25, %v688_v25  ;;  %v524_v38 = vmul.f32 %v1556_v34, %v298_v32  ;;  %v556_v39 = vmul.f32 %v1556_v34, %v426_v33  ;;  %v429_v47 = vpop.f32.mrb[15].mxu1 }
  0xf6   :  { %979 = vst.msk [vmem:[%s1951_s4 + $0x2c] sm:$0xf] %vm967_vm2, %v1145_v28  ;;  %1011 = vst.msk [vmem:[%s1951_s4 + $0xac] sm:$0xf] %vm967_vm2, %v1177_v29  ;;  %v597_v42 = vadd.f32 %v1561_v36, %v526_v30  ;;  %v629_v43 = vadd.f32 %v1561_v36, %v558_v31  ;;  %v527_v44 = vmul.f32 %v1248_v40, %v1556_v34 }
  0xf7   :  { %v559_v45 = vmul.f32 %v1280_v41, %v1556_v34  ;;  %977 = vst.msk [vmem:[%s1951_s4 + $0x24] sm:$0xf] %vm967_vm2, %v1143_v35  ;;  %1009 = vst.msk [vmem:[%s1951_s4 + $0xa4] sm:$0xf] %vm967_vm2, %v1175_v37  ;;  %v595_v48 = vadd.f32 %v1561_v36, %v524_v38  ;;  %v627_v49 = vadd.f32 %v1561_v36, %v556_v39 }
  0xf8   :  { %v525_v50 = vmul.f32 %v1556_v34, %v301_v46  ;;  %v557_v51 = vmul.f32 %v1556_v34, %v429_v47  ;;  %v661_v52 = vmax.f32 %v597_v42, 0.0  ;;  %v693_v53 = vmax.f32 %v629_v43, 0.0 }
  0xf9   :  { %v598_v54 = vadd.f32 %v1561_v36, %v527_v44  ;;  %v630_v55 = vadd.f32 %v1561_v36, %v559_v45  ;;  %v659_v56 = vmax.f32 %v595_v48, 0.0  ;;  %v691_v57 = vmax.f32 %v627_v49, 0.0  ;;  %v1251_v4 = vpop.f32.mrb[16].mxu0 }
  0xfa   :  { %v596_v58 = vadd.f32 %v1561_v36, %v525_v50  ;;  %v628_v59 = vadd.f32 %v1561_v36, %v557_v51  ;;  %v1148_v60 = vpack.c.bf16 %v661_v52, %v661_v52  ;;  %v1180_v61 = vpack.c.bf16 %v693_v53, %v693_v53  ;;  %v1283_v5 = vpop.f32.mrb[16].mxu1  ;;  %v314_v10 = vpop.f32.mrb[17].mxu0 }
  0xfb   :  { %v662_v62 = vmax.f32 %v598_v54, 0.0  ;;  %v694_v63 = vmax.f32 %v630_v55, 0.0  ;;  %v1146_v0 = vpack.c.bf16 %v659_v56, %v659_v56  ;;  %v1178_v1 = vpack.c.bf16 %v691_v57, %v691_v57  ;;  %v442_v11 = vpop.f32.mrb[17].mxu1  ;;  %v1252_v16 = vpop.f32.mrb[18].mxu0 }
  0xfc   :  { %v660_v2 = vmax.f32 %v596_v58, 0.0  ;;  %v692_v3 = vmax.f32 %v628_v59, 0.0  ;;  %982 = vst.msk [vmem:[%s1951_s4 + $0x38] sm:$0xf] %vm967_vm2, %v1148_v60  ;;  %1014 = vst.msk [vmem:[%s1951_s4 + $0xb8] sm:$0xf] %vm967_vm2, %v1180_v61  ;;  %v530_v8 = vmul.f32 %v1251_v4, %v1556_v34  ;;  %v562_v9 = vmul.f32 %v1283_v5, %v1556_v34 }
  0xfd   :  { %v1149_v6 = vpack.c.bf16 %v662_v62, %v662_v62  ;;  %v1181_v7 = vpack.c.bf16 %v694_v63, %v694_v63  ;;  %980 = vst.msk [vmem:[%s1951_s4 + $0x30] sm:$0xf] %vm967_vm2, %v1146_v0  ;;  %1012 = vst.msk [vmem:[%s1951_s4 + $0xb0] sm:$0xf] %vm967_vm2, %v1178_v1  ;;  %v528_v14 = vmul.f32 %v1556_v34, %v314_v10  ;;  %v1284_v17 = vpop.f32.mrb[18].mxu1  ;;  %v317_v22 = vpop.f32.mrb[19].mxu0 }
  0xfe   :  { %v1147_v12 = vpack.c.bf16 %v660_v2, %v660_v2  ;;  %v1179_v13 = vpack.c.bf16 %v692_v3, %v692_v3  ;;  %v560_v15 = vmul.f32 %v1556_v34, %v442_v11  ;;  %v601_v18 = vadd.f32 %v1561_v36, %v530_v8  ;;  %v445_v23 = vpop.f32.mrb[19].mxu1 }
  0xff   :  { %983 = vst.msk [vmem:[%s1951_s4 + $0x3c] sm:$0xf] %vm967_vm2, %v1149_v6  ;;  %1015 = vst.msk [vmem:[%s1951_s4 + $0xbc] sm:$0xf] %vm967_vm2, %v1181_v7  ;;  %v633_v19 = vadd.f32 %v1561_v36, %v562_v9  ;;  %v531_v20 = vmul.f32 %v1252_v16, %v1556_v34  ;;  %v563_v21 = vmul.f32 %v1284_v17, %v1556_v34 }
 0x100   :  { %981 = vst.msk [vmem:[%s1951_s4 + $0x34] sm:$0xf] %vm967_vm2, %v1147_v12  ;;  %1013 = vst.msk [vmem:[%s1951_s4 + $0xb4] sm:$0xf] %vm967_vm2, %v1179_v13  ;;  %v599_v24 = vadd.f32 %v1561_v36, %v528_v14  ;;  %v631_v25 = vadd.f32 %v1561_v36, %v560_v15  ;;  %v529_v26 = vmul.f32 %v1556_v34, %v317_v22  ;;  %v665_v28 = vmax.f32 %v601_v18, 0.0 }
 0x101   :  { %v561_v27 = vmul.f32 %v1556_v34, %v445_v23  ;;  %v697_v29 = vmax.f32 %v633_v19, 0.0  ;;  %v602_v30 = vadd.f32 %v1561_v36, %v531_v20  ;;  %v634_v31 = vadd.f32 %v1561_v36, %v563_v21  ;;  %v1255_v46 = vpop.f32.mrb[20].mxu0 }
 0x102   :  { %v663_v32 = vmax.f32 %v599_v24, 0.0  ;;  %v695_v33 = vmax.f32 %v631_v25, 0.0  ;;  %v600_v35 = vadd.f32 %v1561_v36, %v529_v26  ;;  %v1152_v38 = vpack.c.bf16 %v665_v28, %v665_v28  ;;  %v1287_v47 = vpop.f32.mrb[20].mxu1  ;;  %v330_v52 = vpop.f32.mrb[21].mxu0 }
 0x103   :  { %v632_v37 = vadd.f32 %v1561_v36, %v561_v27  ;;  %v1184_v39 = vpack.c.bf16 %v697_v29, %v697_v29  ;;  %v666_v40 = vmax.f32 %v602_v30, 0.0  ;;  %v698_v41 = vmax.f32 %v634_v31, 0.0  ;;  %v458_v53 = vpop.f32.mrb[21].mxu1  ;;  %v1256_v58 = vpop.f32.mrb[22].mxu0 }
 0x104   :  { %v1150_v42 = vpack.c.bf16 %v663_v32, %v663_v32  ;;  %v1182_v43 = vpack.c.bf16 %v695_v33, %v695_v33  ;;  %v664_v44 = vmax.f32 %v600_v35, 0.0  ;;  %986 = vst.msk [vmem:[%s1951_s4 + $0x48] sm:$0xf] %vm967_vm2, %v1152_v38  ;;  %v534_v50 = vmul.f32 %v1255_v46, %v1556_v34  ;;  %v1288_v59 = vpop.f32.mrb[22].mxu1  ;;  %v333_v0 = vpop.f32.mrb[23].mxu0 }
 0x105   :  { %v696_v45 = vmax.f32 %v632_v37, 0.0  ;;  %1018 = vst.msk [vmem:[%s1951_s4 + $0xc8] sm:$0xf] %vm967_vm2, %v1184_v39  ;;  %v1153_v48 = vpack.c.bf16 %v666_v40, %v666_v40  ;;  %v1185_v49 = vpack.c.bf16 %v698_v41, %v698_v41  ;;  %v566_v51 = vmul.f32 %v1287_v47, %v1556_v34  ;;  %v461_v1 = vpop.f32.mrb[23].mxu1 }
 0x106   :  { %984 = vst.msk [vmem:[%s1951_s4 + $0x40] sm:$0xf] %vm967_vm2, %v1150_v42  ;;  %1016 = vst.msk [vmem:[%s1951_s4 + $0xc0] sm:$0xf] %vm967_vm2, %v1182_v43  ;;  %v1151_v54 = vpack.c.bf16 %v664_v44, %v664_v44  ;;  %v532_v56 = vmul.f32 %v1556_v34, %v330_v52  ;;  %v564_v57 = vmul.f32 %v1556_v34, %v458_v53 }
 0x107   :  { %v1183_v55 = vpack.c.bf16 %v696_v45, %v696_v45  ;;  %987 = vst.msk [vmem:[%s1951_s4 + $0x4c] sm:$0xf] %vm967_vm2, %v1153_v48  ;;  %1019 = vst.msk [vmem:[%s1951_s4 + $0xcc] sm:$0xf] %vm967_vm2, %v1185_v49  ;;  %v605_v60 = vadd.f32 %v1561_v36, %v534_v50  ;;  %v637_v61 = vadd.f32 %v1561_v36, %v566_v51 }
 0x108   :  { %v535_v62 = vmul.f32 %v1256_v58, %v1556_v34  ;;  %v567_v63 = vmul.f32 %v1288_v59, %v1556_v34  ;;  %985 = vst.msk [vmem:[%s1951_s4 + $0x44] sm:$0xf] %vm967_vm2, %v1151_v54  ;;  %v603_v2 = vadd.f32 %v1561_v36, %v532_v56  ;;  %v635_v3 = vadd.f32 %v1561_v36, %v564_v57 }
 0x109   :  { %1017 = vst.msk [vmem:[%s1951_s4 + $0xc4] sm:$0xf] %vm967_vm2, %v1183_v55  ;;  %v533_v4 = vmul.f32 %v1556_v34, %v333_v0  ;;  %v565_v5 = vmul.f32 %v1556_v34, %v461_v1  ;;  %v669_v6 = vmax.f32 %v605_v60, 0.0  ;;  %v701_v7 = vmax.f32 %v637_v61, 0.0  ;;  %v1259_v22 = vpop.f32.mrb[24].mxu0 }
 0x10a   :  { %v606_v8 = vadd.f32 %v1561_v36, %v535_v62  ;;  %v638_v9 = vadd.f32 %v1561_v36, %v567_v63  ;;  %v667_v10 = vmax.f32 %v603_v2, 0.0  ;;  %v699_v11 = vmax.f32 %v635_v3, 0.0  ;;  %v1291_v23 = vpop.f32.mrb[24].mxu1  ;;  %v346_v28 = vpop.f32.mrb[25].mxu0 }
 0x10b   :  { %v604_v12 = vadd.f32 %v1561_v36, %v533_v4  ;;  %v636_v13 = vadd.f32 %v1561_v36, %v565_v5  ;;  %v1156_v14 = vpack.c.bf16 %v669_v6, %v669_v6  ;;  %v1188_v15 = vpack.c.bf16 %v701_v7, %v701_v7  ;;  %v474_v29 = vpop.f32.mrb[25].mxu1  ;;  %v1260_v35 = vpop.f32.mrb[26].mxu0 }
 0x10c   :  { %v670_v16 = vmax.f32 %v606_v8, 0.0  ;;  %v702_v17 = vmax.f32 %v638_v9, 0.0  ;;  %v1154_v18 = vpack.c.bf16 %v667_v10, %v667_v10  ;;  %v1186_v19 = vpack.c.bf16 %v699_v11, %v699_v11  ;;  %v1292_v37 = vpop.f32.mrb[26].mxu1  ;;  %v349_v42 = vpop.f32.mrb[27].mxu0 }
 0x10d   :  { %v668_v20 = vmax.f32 %v604_v12, 0.0  ;;  %v700_v21 = vmax.f32 %v636_v13, 0.0  ;;  %990 = vst.msk [vmem:[%s1951_s4 + $0x58] sm:$0xf] %vm967_vm2, %v1156_v14  ;;  %1022 = vst.msk [vmem:[%s1951_s4 + $0xd8] sm:$0xf] %vm967_vm2, %v1188_v15  ;;  %v538_v26 = vmul.f32 %v1259_v22, %v1556_v34  ;;  %v570_v27 = vmul.f32 %v1291_v23, %v1556_v34 }
 0x10e   :  { %v1157_v24 = vpack.c.bf16 %v670_v16, %v670_v16  ;;  %v1189_v25 = vpack.c.bf16 %v702_v17, %v702_v17  ;;  %988 = vst.msk [vmem:[%s1951_s4 + $0x50] sm:$0xf] %vm967_vm2, %v1154_v18  ;;  %1020 = vst.msk [vmem:[%s1951_s4 + $0xd0] sm:$0xf] %vm967_vm2, %v1186_v19  ;;  %v536_v32 = vmul.f32 %v1556_v34, %v346_v28  ;;  %v477_v43 = vpop.f32.mrb[27].mxu1 }
 0x10f   :  { %v1155_v30 = vpack.c.bf16 %v668_v20, %v668_v20  ;;  %v1187_v31 = vpack.c.bf16 %v700_v21, %v700_v21  ;;  %v568_v33 = vmul.f32 %v1556_v34, %v474_v29  ;;  %v609_v38 = vadd.f32 %v1561_v36, %v538_v26 }
 0x110   :  { %991 = vst.msk [vmem:[%s1951_s4 + $0x5c] sm:$0xf] %vm967_vm2, %v1157_v24  ;;  %1023 = vst.msk [vmem:[%s1951_s4 + $0xdc] sm:$0xf] %vm967_vm2, %v1189_v25  ;;  %v641_v39 = vadd.f32 %v1561_v36, %v570_v27  ;;  %v539_v40 = vmul.f32 %v1260_v35, %v1556_v34  ;;  %v571_v41 = vmul.f32 %v1292_v37, %v1556_v34 }
 0x111   :  { %989 = vst.msk [vmem:[%s1951_s4 + $0x54] sm:$0xf] %vm967_vm2, %v1155_v30  ;;  %1021 = vst.msk [vmem:[%s1951_s4 + $0xd4] sm:$0xf] %vm967_vm2, %v1187_v31  ;;  %v607_v44 = vadd.f32 %v1561_v36, %v536_v32  ;;  %v639_v45 = vadd.f32 %v1561_v36, %v568_v33  ;;  %v537_v46 = vmul.f32 %v1556_v34, %v349_v42  ;;  %v673_v48 = vmax.f32 %v609_v38, 0.0  ;;  %v1263_v0 = vpop.f32.mrb[28].mxu0 }
 0x112   :  { %v569_v47 = vmul.f32 %v1556_v34, %v477_v43  ;;  %v705_v49 = vmax.f32 %v641_v39, 0.0  ;;  %v610_v50 = vadd.f32 %v1561_v36, %v539_v40  ;;  %v642_v51 = vadd.f32 %v1561_v36, %v571_v41  ;;  %v1295_v1 = vpop.f32.mrb[28].mxu1  ;;  %v362_v6 = vpop.f32.mrb[29].mxu0 }
 0x113   :  { %v671_v52 = vmax.f32 %v607_v44, 0.0  ;;  %v703_v53 = vmax.f32 %v639_v45, 0.0  ;;  %v608_v54 = vadd.f32 %v1561_v36, %v537_v46  ;;  %v1160_v56 = vpack.c.bf16 %v673_v48, %v673_v48  ;;  %v490_v7 = vpop.f32.mrb[29].mxu1  ;;  %v1264_v12 = vpop.f32.mrb[30].mxu0 }
 0x114   :  { %v640_v55 = vadd.f32 %v1561_v36, %v569_v47  ;;  %v1192_v57 = vpack.c.bf16 %v705_v49, %v705_v49  ;;  %v674_v58 = vmax.f32 %v610_v50, 0.0  ;;  %v706_v59 = vmax.f32 %v642_v51, 0.0  ;;  %v1296_v13 = vpop.f32.mrb[30].mxu1  ;;  %v365_v18 = vpop.f32.mrb[31].mxu0 }
 0x115   :  { %v1158_v60 = vpack.c.bf16 %v671_v52, %v671_v52  ;;  %v1190_v61 = vpack.c.bf16 %v703_v53, %v703_v53  ;;  %v672_v62 = vmax.f32 %v608_v54, 0.0  ;;  %994 = vst.msk [vmem:[%s1951_s4 + $0x68] sm:$0xf] %vm967_vm2, %v1160_v56  ;;  %v542_v4 = vmul.f32 %v1263_v0, %v1556_v34  ;;  %v493_v19 = vpop.f32.mrb[31].mxu1 }
 0x116   :  { %v704_v63 = vmax.f32 %v640_v55, 0.0  ;;  %1026 = vst.msk [vmem:[%s1951_s4 + $0xe8] sm:$0xf] %vm967_vm2, %v1192_v57  ;;  %v1161_v2 = vpack.c.bf16 %v674_v58, %v674_v58  ;;  %v1193_v3 = vpack.c.bf16 %v706_v59, %v706_v59  ;;  %v574_v5 = vmul.f32 %v1295_v1, %v1556_v34 }
 0x117   :  { %992 = vst.msk [vmem:[%s1951_s4 + $0x60] sm:$0xf] %vm967_vm2, %v1158_v60  ;;  %1024 = vst.msk [vmem:[%s1951_s4 + $0xe0] sm:$0xf] %vm967_vm2, %v1190_v61  ;;  %v1159_v8 = vpack.c.bf16 %v672_v62, %v672_v62  ;;  %v540_v10 = vmul.f32 %v1556_v34, %v362_v6  ;;  %v572_v11 = vmul.f32 %v1556_v34, %v490_v7 }
 0x118   :  { %v1191_v9 = vpack.c.bf16 %v704_v63, %v704_v63  ;;  %995 = vst.msk [vmem:[%s1951_s4 + $0x6c] sm:$0xf] %vm967_vm2, %v1161_v2  ;;  %1027 = vst.msk [vmem:[%s1951_s4 + $0xec] sm:$0xf] %vm967_vm2, %v1193_v3  ;;  %v613_v14 = vadd.f32 %v1561_v36, %v542_v4  ;;  %v645_v15 = vadd.f32 %v1561_v36, %v574_v5 }
 0x119   :  { %v543_v16 = vmul.f32 %v1264_v12, %v1556_v34  ;;  %v575_v17 = vmul.f32 %v1296_v13, %v1556_v34  ;;  %993 = vst.msk [vmem:[%s1951_s4 + $0x64] sm:$0xf] %vm967_vm2, %v1159_v8  ;;  %v611_v20 = vadd.f32 %v1561_v36, %v540_v10  ;;  %v643_v21 = vadd.f32 %v1561_v36, %v572_v11 }
 0x11a   :  { %1025 = vst.msk [vmem:[%s1951_s4 + $0xe4] sm:$0xf] %vm967_vm2, %v1191_v9  ;;  %v541_v22 = vmul.f32 %v1556_v34, %v365_v18  ;;  %v573_v23 = vmul.f32 %v1556_v34, %v493_v19  ;;  %v677_v24 = vmax.f32 %v613_v14, 0.0  ;;  %v709_v25 = vmax.f32 %v645_v15, 0.0 }
 0x11b   :  { %v614_v26 = vadd.f32 %v1561_v36, %v543_v16  ;;  %v646_v27 = vadd.f32 %v1561_v36, %v575_v17  ;;  %v675_v28 = vmax.f32 %v611_v20, 0.0  ;;  %v707_v29 = vmax.f32 %v643_v21, 0.0 }
 0x11c   :  { %v612_v30 = vadd.f32 %v1561_v36, %v541_v22  ;;  %v644_v31 = vadd.f32 %v1561_v36, %v573_v23  ;;  %v1164_v32 = vpack.c.bf16 %v677_v24, %v677_v24  ;;  %v1196_v33 = vpack.c.bf16 %v709_v25, %v709_v25 }
 0x11d   :  { %v678_v35 = vmax.f32 %v614_v26, 0.0  ;;  %v710_v37 = vmax.f32 %v646_v27, 0.0  ;;  %v1162_v38 = vpack.c.bf16 %v675_v28, %v675_v28  ;;  %v1194_v39 = vpack.c.bf16 %v707_v29, %v707_v29 }
 0x11e   :  { %v676_v40 = vmax.f32 %v612_v30, 0.0  ;;  %v708_v34 = vmax.f32 %v644_v31, 0.0  ;;  %998 = vst.msk [vmem:[%s1951_s4 + $0x78] sm:$0xf] %vm967_vm2, %v1164_v32  ;;  %1030 = vst.msk [vmem:[%s1951_s4 + $0xf8] sm:$0xf] %vm967_vm2, %v1196_v33 }
 0x11f   :  { %v1165_v41 = vpack.c.bf16 %v678_v35, %v678_v35  ;;  %v1197_v36 = vpack.c.bf16 %v710_v37, %v710_v37  ;;  %996 = vst.msk [vmem:[%s1951_s4 + $0x70] sm:$0xf] %vm967_vm2, %v1162_v38  ;;  %1028 = vst.msk [vmem:[%s1951_s4 + $0xf0] sm:$0xf] %vm967_vm2, %v1194_v39 }
 0x120   :  { %v1163_v42 = vpack.c.bf16 %v676_v40, %v676_v40  ;;  %v1195_v43 = vpack.c.bf16 %v708_v34, %v708_v34 }
 0x121   :  { %999 = vst.msk [vmem:[%s1951_s4 + $0x7c] sm:$0xf] %vm967_vm2, %v1165_v41  ;;  %1031 = vst.msk [vmem:[%s1951_s4 + $0xfc] sm:$0xf] %vm967_vm2, %v1197_v36 }
 0x122   :  { %997 = vst.msk [vmem:[%s1951_s4 + $0x74] sm:$0xf] %vm967_vm2, %v1163_v42  ;;  %1029 = vst.msk [vmem:[%s1951_s4 + $0xf4] sm:$0xf] %vm967_vm2, %v1195_v43 }

// kernel: bottleneck_transform_forward.5
= control target key start
LH: loop header
LB: loop body
LE: loop exit
PB: predicated region body
PF: predicated region fallthrough
CT: control target
= control target key end

     0   :  { %14 = vsyncpa [#allocation4], 0  ;;  %s1248_s0 = inlined_call_operand.vmem [shape: bf16[2,64,16], index: 0, kind: input, shape index: {}]   ;;  %s1249_s1 = inlined_call_operand.vmem [shape: f32[2,1,16], index: 1, kind: input, shape index: {}]   ;;  %s1250_s2 = inlined_call_operand.vmem [shape: bf16[16,2], index: 2, kind: input, shape index: {}]   ;;  %s1251_s3 = inlined_call_operand.vmem [shape: f32[1,2], index: 3, kind: input, shape index: {}]   ;;  %s1252_s4 = inlined_call_operand.vmem [shape: bf16[2,16], index: 4, kind: input, shape index: {}]   ;;  %s1253_s5 = inlined_call_operand.vmem [shape: f32[1,16], index: 5, kind: input, shape index: {}]   ;;  %s1254_s6 = inlined_call_operand.vmem [shape: bf16[16,16], index: 6, kind: input, shape index: {}]   ;;  %s1255_s7 = inlined_call_operand.vmem [shape: f32[1,16], index: 7, kind: input, shape index: {}]   ;;  %s1256_s8 = inlined_call_operand.vmem [shape: f32[1,16], index: 8, kind: input, shape index: {}]   ;;  %s1257_s9 = inlined_call_operand.hbm [shape: bf16[2,64,16], index: 9, kind: output, shape index: {}]  }
   0x1   :  { %16 = vsyncpa [#allocation4 + $0x1], 0  ;;  %s1088_s30 = smov 0   ;;  %s1090_s10 = smov 0  }
   0x2   :  { %s1092_s11 = smov 0   ;;  %s1094_s12 = smov 0  }
   0x3   :  { %s1096_s13 = smov 0   ;;  %s1098_s14 = smov 0  }
   0x4 LB: > { %s810_s15 = sadd.s32 4294967295, %s1031_s14   ;;  %s811_s16 = sadd.s32 4294967294, %s1031_s14   ;;  %s1031_s14 = sphi %s1098_s14, %s22_s14   ;;  %s1027_s13 = sphi %s1096_s13, %s1264_s13   ;;  %s1023_s12 = sphi %s1094_s12, %s1263_s12   ;;  %s1019_s11 = sphi %s1092_s11, %s1262_s11   ;;  %s1015_s10 = sphi %s1090_s10, %s1261_s10   ;;  %s1011_s30 = sphi %s1088_s30, %s1260_s30  }
   0x5   : > { %s34_s17 = sadd.s32 1, %s1027_s13  ;;  %s244_s18 = sadd.s32 1, %s1019_s11 }
   0x6   : > { %p36_p0 = scmp.ge.s32.totalorder %s34_s17, 2  ;;  %p254_p1 = scmp.ne.s32.totalorder %s1019_s11, %s1015_s10 }
   0x7   : > { %p255_p2 = scmp.eq.s32.totalorder %s810_s15, 1  ;;  %p260_p3 = scmp.ne.s32.totalorder %s1015_s10, %s1011_s30 }
   0x8   : > { %s1266_s17 = smov (%p36_p0, %s34_s17), 0  ;;  %p261_p5 = scmp.eq.s32.totalorder %s811_s16, 1 }
   0x9   : > { %p1128_p4 = por %p255_p2, %p254_p1  ;;  %s239_s20 = ssub.s32 %s1027_s13, %s1266_s17 }
   0xa   : > { %p814_p6 = scmp.ge.s32.totalorder %s1031_s14, 1  ;;  %p242_p7 = scmp.eq.s32.totalorder %s239_s20, 0 }
   0xb   : > { %p1135_p8 = por %p261_p5, %p260_p3  ;;  %p319_p9 = scmp.lt.s32.totalorder %s1031_s14, 3 }
   0xc   : > { %s1141_s22 = scalar_select %p242_p7, %s1019_s11, %s244_s18  }
   0xd   : > { %p320_p10 = pnand %p814_p6, %p319_p9 }
   0xe   : > { %v947_v0 = vld [vmem:[%s1250_s2] sm:$0xff] (!%p320_p10)   ;;  %v1033_v1 = vmov (!%p320_p10), 0.0   ;;  %p363_p11 = scmp.lt.s32.totalorder (!%p320_p10), %s1023_s12, 1  ;;  %vm1034_vm0 = vmmov (!%p320_p10), 0   ;;  %vm444_vm1 = vcmask (!%p320_p10), 1040384   ;;  %vm392_vm2 = vcmask (!%p320_p10), 130048  }
   0xf   : > { %323 = sbr.rel (%p320_p10) target bundleno = 752 (0x2f0), region = 56  ;;  %866 = vmatprep.subr.bf16.mxu1 (!%p320_p10), %v1033_v1  ;;  %868 = vmatprep.mubr.msk.bf16.mxu1 (!%p320_p10), %vm1034_vm0, %v1033_v1  ;;  %v438_v2 = vld [vmem:[%s1252_s4] sm:$0x1] (!%p320_p10)  ;;  %vm440_vm3 = vcmask (!%p320_p10), 15360   ;;  %vm495_vm4 = vcmask (!%p320_p10), 122880   ;;  %v513_v27 = vlaneseq (!%p320_p10)  ;;  %vm697_vm7 = vcmask (!%p320_p10), 125952  }
  0x10   : > { %867 = vmatpush3.bf16.msra.mxu1 (!%p320_p10), %v947_v0  ;;  %v446_v5 = vsel (!%p320_p10), %vm444_vm1, %v438_v2, 0  ;;  %v385_v6 = vld [vmem:[%s1251_s3] sm:$0x1] (!%p320_p10)  ;;  %vm496_vm5 = vsmask.f32 (!%p320_p10), 256  ;;  %s1035_s20 = smov (!%p320_p10), [#allocation3]  }
  0x11   : > { %872 = vmatprep.subr.bf16.mxu1 (!%p320_p10), %v1033_v1  ;;  %v948_v14 = vld [vmem:[%s1254_s6] sm:$0xff] (!%p320_p10)   ;;  %vm497_vm6 = vmand (!%p320_p10), %vm495_vm4, %vm496_vm5  ;;  %v514_v29 = vshrl.u32 (!%p320_p10), %v513_v27, 7  ;;  %s957_s23 = sshll.u32 (!%p320_p10), %s1035_s20, 4  ;;  %s958_s23 = int_to_ptr.vmem [resolvable:$false] %s957_s23 }
  0x12   : > { %878 = vmatprep.subr.bf16.mxu0 (!%p320_p10), %v948_v14  ;;  %v439_v15 = vld [vmem:[%s1253_s5] sm:$0x1] (!%p320_p10) }
  0x13   : > { %879 = vmatpush3.bf16.msra.mxu0 (!%p320_p10), %v948_v14  ;;  %v498_v25 = vld [vmem:[#allocation2] sm:$0x1] (!%p320_p10)  ;;  %v515_v30 = vsub.s32 (!%p320_p10), 0, %v514_v29 }
  0x14   : > { %v832_v55 = vld [vmem:[%s1255_s7] ss:$0 sm:$0xff] (!%p320_p10) }
  0x15   : > { %v833_v57 = vld [vmem:[%s1256_s8] ss:$0 sm:$0xff] (!%p320_p10) }
  0x16   : > { %s1148_s25 = scalar_select %p363_p11, %s1023_s12, 1 }
  0x18   : > { %s374_s15 = scalar_lea.vmem %s1249_s1, %s1148_s25  ;;  %s847_s27 = sshll.u32 %s1148_s25, 5 }
  0x19   : > { %v381_v3 = vld [vmem:[%s374_s15] sm:$0x1]  ;;  %s370_s15 = scalar_lea.vmem %s1248_s0, %s847_s27  ;;  %s359_s25 = sand.u32 1, %s1015_s10  }
  0x1a   : > { %v382_v4 = vpack.c.bf16 %v381_v3, %v381_v3  ;;  %v501_v33 = vld [vmem:[%s370_s15] sm:$0xf]  ;;  %v502_v35 = vld [vmem:[%s370_s15 + $0x4] sm:$0xf]  ;;  %v503_v36 = vld [vmem:[%s370_s15 + $0x8] sm:$0xf] }
  0x1b   : > { %v504_v37 = vld [vmem:[%s370_s15 + $0xc] sm:$0xf]  ;;  %v505_v39 = vld [vmem:[%s370_s15 + $0x10] sm:$0xf]  ;;  %v506_v40 = vld [vmem:[%s370_s15 + $0x14] sm:$0xf] }
  0x1c   : > { %869 = vmatmul.mubr.msk.bf16.vlgmr.msra.gmra.mrb[0].mxu1 %vm392_vm2, %v382_v4  ;;  %v507_v50 = vld [vmem:[%s370_s15 + $0x18] sm:$0xf]  ;;  %v508_v51 = vld [vmem:[%s370_s15 + $0x1c] sm:$0xf]  ;;  %s815_s24 = sshll.u32 %s359_s25, 5  ;;  %s856_s27 = sshll.u32 %s1023_s12, 9 }
  0x1d   : > { %873 = vmatpush3.bf16.msra.mxu1 %v446_v5  ;;  %874 = vmatprep.mubr.msk.bf16.mxu1 %vm1034_vm0, %v1033_v1  ;;  %s361_s26 = scalar_lea.vmem [#allocation3], %s815_s24  ;;  %s1193_s16 = scalar_lea.hbm %s1257_s9, %s856_s27 }
  0x1e   : > { %s722_s28 = sshll.u32 %s361_s26, 4  ;;  %s1202_s12 = scalar_lea.sflag [#allocation4], %s359_s25  ;;  %s1195_s28 = int_to_ptr.vmem [resolvable:$true] %s722_s28 }
  0x1f   : > { %s953_s18 = scalar_lea.vmem %s1195_s28, 512  ;;  %s959_s24 = scalar_lea.vmem %s958_s23, 1024 }
  0x20   : > { %p954_p12 = scmp.ne.s32.totalorder %s1195_s28, %s953_s18  ;;  %p960_p1 = scmp.lt.s32.totalorder %s1195_s28, %s958_s23 }
  0x21   : > { %p961_p2 = scmp.lt.s32.totalorder %s959_s24, %s953_s18 }
  0x22   : > { %p955_p13 = pnand %p954_p12, %p1128_p4 }
  0x23   : > { %p962_p3 = por %p961_p2, %p960_p1 }
  0x24   : > { %p956_p0 = pneg %p955_p13 }
  0x26   : > { %p963_p5 = pnand %p962_p3, %p956_p0 }
  0xef   : > { %v430_v7 = vpop.f32.mrb[0].mxu1 }
  0xf0   : > { %v431_v8 = vadd.f32 %v430_v7, %v385_v6  ;;  %v870_v9 = vpop.f32.mrb[1].mxu1 }
  0xf1   : > { %v433_v10 = vpop.f32.mrb[2].mxu1 }
  0xf2   : > { %v436_v11 = vmax.f32 %v431_v8, 0.0  ;;  %v871_v12 = vpop.f32.mrb[3].mxu1 }
  0xf4   : > { %v437_v13 = vpack.c.bf16 %v436_v11, %v436_v11 }
  0xf6   : > { %875 = vmatmul.mubr.msk.bf16.vlgmr.msra.gmra.mrb[4].mxu1 %vm440_vm3, %v437_v13 }
 0x1c9   : > { %v482_v16 = vpop.f32.mrb[4].mxu1 }
 0x1ca   : > { %v483_v17 = vadd.f32 %v482_v16, %v439_v15  ;;  %v876_v18 = vpop.f32.mrb[5].mxu1 }
 0x1cb   : > { %v485_v19 = vpop.f32.mrb[6].mxu1 }
 0x1cc   : > { %v821_v20 = vmul.f32 -1.442695, %v483_v17  ;;  %v877_v21 = vpop.f32.mrb[7].mxu1 }
 0x1ce   : > { %949 = vpow2.f32 %v821_v20 }
 0x1d8   : > { %v950_v22 = vpop.eup %949 }
 0x1d9   : > { %v491_v23 = vadd.f32 1.0, %v950_v22 }
 0x1db   : > { %951 = vrcp.f32 %v491_v23 }
 0x1e5   : > { %v952_v24 = vpop.eup %951 }
 0x1e6   : > { %v494_v26 = vpack.c.bf16 %v952_v24, %v952_v24 }
 0x1e8   : > { %v499_v28 = vsel %vm497_vm6, %v494_v26, %v498_v25 }
 0x1e9   : > { %500 = vst [vmem:[#allocation2] sm:$0x1] %v499_v28 }
 0x1f0   : > { %v509_v31 = vld [vmem:[#allocation2] sm:$0x1] }
 0x1f1   : > { %v511_v32 = vpack.i.b16 %v509_v31, %v509_v31 }
 0x1f3   : > { %v516_v34 = vrot.slane %v511_v32, %v515_v30 }
 0x1f5   : > { %v822_v38 = vcombine.low %v516_v34, %v516_v34 }
 0x1f7   : > { %v521_v41 = vmul.bf16 %v822_v38, %v501_v33  ;;  %v522_v42 = vmul.bf16 %v822_v38, %v502_v35  ;;  %v523_v43 = vmul.bf16 %v822_v38, %v503_v36  ;;  %v524_v44 = vmul.bf16 %v822_v38, %v504_v37 }
 0x1f8   : > { %v525_v45 = vmul.bf16 %v822_v38, %v505_v39  ;;  %v526_v46 = vmul.bf16 %v822_v38, %v506_v40  ;;  %v527_v52 = vmul.bf16 %v822_v38, %v507_v50  ;;  %v528_v53 = vmul.bf16 %v822_v38, %v508_v51 }
 0x1f9   : > { %v823_v47 = vcombine.low %v521_v41, %v522_v42  ;;  %v824_v48 = vcombine.low %v523_v43, %v524_v44 }
 0x1fa   : > { %v825_v49 = vcombine.low %v525_v45, %v526_v46  ;;  %v826_v54 = vcombine.low %v527_v52, %v528_v53 }
 0x1fb   : > { %880 = vmatprep.mubr.msk.bf16.mxu0 %vm392_vm2, %v823_v47 }
 0x1fc   : > { %881 = vmatmul.mubr.msk.bf16.vlgmr.msra.gmra.mrb[0].mxu0 %vm392_vm2, %v824_v48 }
 0x1fd   : > { %884 = vmatprep.mubr.msk.bf16.mxu0 %vm392_vm2, %v825_v49 }
 0x204   : > { %885 = vmatmul.mubr.msk.bf16.gmra.mrb[4].mxu0 %vm392_vm2, %v826_v54 }
 0x2cf   : > { %v882_v56 = vpop.f32.mrb[0].mxu0 }
 0x2d0   : > { %v644_v58 = vmul.f32 %v882_v56, %v832_v55  ;;  %v604_v59 = vpop.f32.mrb[1].mxu0 }
 0x2d1   : > { %v642_v60 = vmul.f32 %v832_v55, %v604_v59  ;;  %v883_v61 = vpop.f32.mrb[2].mxu0 }
 0x2d2   : > { %v659_v62 = vadd.f32 %v833_v57, %v644_v58  ;;  %v645_v63 = vmul.f32 %v883_v61, %v832_v55  ;;  %v607_v0 = vpop.f32.mrb[3].mxu0 }
 0x2d3   : > { %v657_v1 = vadd.f32 %v833_v57, %v642_v60  ;;  %v643_v2 = vmul.f32 %v832_v55, %v607_v0 }
 0x2d4   : > { %v850_v3 = vpack.c.bf16 %v659_v62, %v659_v62  ;;  %v660_v4 = vadd.f32 %v833_v57, %v645_v63 }
 0x2d5   : > { %v848_v5 = vpack.c.bf16 %v657_v1, %v657_v1  ;;  %v658_v6 = vadd.f32 %v833_v57, %v643_v2 }
 0x2d6   : > { %700 = vst.msk [vmem:[%s361_s26 + $0x8] sm:$0xf] %vm697_vm7, %v850_v3  ;;  %v851_v7 = vpack.c.bf16 %v660_v4, %v660_v4 }
 0x2d7   : > { %698 = vst.msk [vmem:[%s361_s26] sm:$0xf] %vm697_vm7, %v848_v5  ;;  %v849_v8 = vpack.c.bf16 %v658_v6, %v658_v6  ;;  %v886_v9 = vpop.f32.mrb[4].mxu0 }
 0x2d8   : > { %701 = vst.msk [vmem:[%s361_s26 + $0xc] sm:$0xf] %vm697_vm7, %v851_v7  ;;  %v648_v10 = vmul.f32 %v886_v9, %v832_v55  ;;  %v620_v11 = vpop.f32.mrb[5].mxu0 }
 0x2d9   : > { %699 = vst.msk [vmem:[%s361_s26 + $0x4] sm:$0xf] %vm697_vm7, %v849_v8  ;;  %v646_v12 = vmul.f32 %v832_v55, %v620_v11  ;;  %v887_v13 = vpop.f32.mrb[6].mxu0 }
 0x2da   : > { %v663_v14 = vadd.f32 %v833_v57, %v648_v10  ;;  %v649_v15 = vmul.f32 %v887_v13, %v832_v55  ;;  %v623_v16 = vpop.f32.mrb[7].mxu0 }
 0x2db   : > { %v661_v17 = vadd.f32 %v833_v57, %v646_v12  ;;  %v647_v18 = vmul.f32 %v832_v55, %v623_v16 }
 0x2dc   : > { %v854_v19 = vpack.c.bf16 %v663_v14, %v663_v14  ;;  %v664_v20 = vadd.f32 %v833_v57, %v649_v15 }
 0x2dd   : > { %v852_v21 = vpack.c.bf16 %v661_v17, %v661_v17  ;;  %v662_v22 = vadd.f32 %v833_v57, %v647_v18 }
 0x2de   : > { %704 = vst.msk [vmem:[%s361_s26 + $0x18] sm:$0xf] %vm697_vm7, %v854_v19  ;;  %v855_v23 = vpack.c.bf16 %v664_v20, %v664_v20 }
 0x2df   : > { %702 = vst.msk [vmem:[%s361_s26 + $0x10] sm:$0xf] %vm697_vm7, %v852_v21  ;;  %v853_v24 = vpack.c.bf16 %v662_v22, %v662_v22 }
 0x2e0   : > { %705 = vst.msk [vmem:[%s361_s26 + $0x1c] sm:$0xf] %vm697_vm7, %v855_v23 }
 0x2e1   : > { %703 = vst.msk [vmem:[%s361_s26 + $0x14] sm:$0xf] %vm697_vm7, %v853_v24 }
 0x2e2   : > { %966 = shalt.err (!%p963_p5)
}
 0x2e3   : > { %s967_s25 = scalar_lea.hbm %s1193_s16, 512  ;;  %s971_s29 = scalar_lea.hbm %s1257_s9, 1024 }
 0x2e4   : > { %p968_p6 = scmp.ne.s32.totalorder %s1193_s16, %s967_s25  ;;  %p972_p10 = scmp.lt.u32.totalorder %s1193_s16, %s1257_s9 }
 0x2e5   : > { %p973_p11 = scmp.lt.u32.totalorder %s971_s29, %s967_s25  ;;  %p975_p13 = scmp.lt.u32.totalorder %s967_s25, %s1193_s16 }
 0x2e6   : > { %p969_p7 = pnand %p968_p6, %p1128_p4 }
 0x2e7   : > { %p974_p12 = por %p973_p11, %p972_p10 }
 0x2e8   : > { %p970_p9 = pneg %p969_p7 }
 0x2e9   : > { %p976_p0 = por %p975_p13, %p974_p12 }
 0x2eb   : > { %p977_p1 = pnand %p976_p0, %p970_p9 }
 0x2ed   : > { %980 = shalt.err (!%p977_p1)
}
 0x2ee   : > { %s1036_s18 = smov 64   ;;  %s1037_s23 = smov 4  }
 0x2ef   : > { %888 = dma.vmem_to_hbm [thread:$0]  (%p1128_p4), %s1195_s28, 512, %s1193_s16, %s1202_s12, %s1036_s18, %s1036_s18, %s1037_s23  }
 0x2f0 PF: > { %p894_p2 = scmp.ge.s32.totalorder %s1031_s14, 2  ;;  %s737_s24 = sand.u32 1, %s1011_s30  }
 0x2f1   : > { %s738_s25 = scalar_lea.sflag [#allocation4], %s737_s24 }
 0x2f2   : > { %p891_p3 = pnand %p894_p2, %p1135_p8 }
 0x2f4   : > { %1006 = dma.done.wait (!%p891_p3), %s738_s25, 512  }
 0x2f5   : > { %1008 = vsyncadd (!%p891_p3), %s738_s25, 4294966784  ;;  %s22_s14 = sadd.s32 1, %s1031_s14   ;;  %s1260_s30 = smov %s1015_s10 }
 0x2f6   : > { %p19_p5 = scmp.ge.s32.totalorder %s22_s14, 4   ;;  %s1261_s10 = smov %s1019_s11 }
 0x2f7   : > { %s1262_s11 = smov %s1141_s22  ;;  %s1263_s12 = smov %s1027_s13 }
 0x2f8   : > { %s1264_s13 = smov %s1266_s17  ;;  %21 = sbr.rel (!%p19_p5) target bundleno = 4 (0x4), region = 98 }
 0x2ff   :  { %743 = vsyncpa [#allocation4], 1 }
 0x300   :  { %745 = vsyncpa [#allocation4 + $0x1], 1 }

// kernel: bottleneck_transform_forward.4
= control target key start
LH: loop header
LB: loop body
LE: loop exit
PB: predicated region body
PF: predicated region fallthrough
CT: control target
= control target key end

     0   :  { %s1598_s18 = smov 0   ;;  %s1600_s19 = smov 0   ;;  %s2043_s0 = inlined_call_operand.vmem [shape: bf16[4,4,5,9,16], index: 0, kind: input, shape index: {}]   ;;  %s2044_s1 = inlined_call_operand.vmem [shape: bf16[2,72,8], index: 1, kind: input, shape index: {}]   ;;  %s2045_s2 = inlined_call_operand.vmem [shape: f32[1,16], index: 2, kind: input, shape index: {}]   ;;  %s2046_s3 = inlined_call_operand.vmem [shape: f32[1,16], index: 3, kind: input, shape index: {}]   ;;  %s2047_s4 = inlined_call_operand.vmem [shape: bf16[2,8,8,16], index: 4, kind: output, shape index: {0}]   ;;  %s2048_s5 = inlined_call_operand.vmem [shape: f32[2,1,16], index: 5, kind: output, shape index: {1}]  }
   0x1   :  { %s1602_s20 = smov 0   ;;  %s1604_s21 = smov 0  }
   0x2   :  { %s1606_s22 = smov 0  }
   0x3 LB: > { %s25_s23 = sadd.s32 1, %s1547_s20  ;;  %s28_s24 = sadd.s32 1, %s1551_s21  ;;  %s1555_s22 = sphi %s1606_s22, %s16_s22   ;;  %s1551_s21 = sphi %s1604_s21, %s2054_s21   ;;  %s1547_s20 = sphi %s1602_s20, %s2053_s20   ;;  %s1543_s19 = sphi %s1600_s19, %s2052_s19   ;;  %s1539_s18 = sphi %s1598_s18, %s2051_s18  }
   0x4   : > { %p26_p0 = scmp.ge.s32.totalorder %s25_s23, 2  ;;  %p1307_p1 = scmp.ge.s32.totalorder %s1555_s22, 1 }
   0x5   : > { %p212_p2 = scmp.lt.s32.totalorder %s1555_s22, 5 }
   0x6   : > { %s2056_s23 = smov (%p26_p0, %s25_s23), 0  ;;  %s2058_s24 = smov (!%p26_p0, %s28_s24), %s1551_s21 }
   0x7   : > { %p213_p3 = pnand %p1307_p1, %p212_p2  ;;  %p30_p4 = scmp.ge.s32.totalorder %s2058_s24, 2 }
   0x8   : > { %s1308_s25 = sshll.u32 (!%p213_p3), %s1543_s19, 1  ;;  %s1310_s26 = sshll.u32 (!%p213_p3), %s1539_s18, 2 }
   0x9   : > { %s2060_s24 = smov (%p30_p4, %s2058_s24), 0  ;;  %216 = sbr.rel (%p213_p3) target bundleno = 548 (0x224), region = 36 }
   0xa   : > { %s250_s27 = sadd.s32 (!%p213_p3), %s1539_s18, %s1308_s25  ;;  %p259_p5 = scmp.lt.s32.totalorder (!%p213_p3), %s1543_s19, 1 }
   0xb   : > { %p251_p6 = scmp.lt.s32.totalorder (!%p213_p3), %s250_s27, 3  ;;  %p261_p7 = scmp.lt.s32.totalorder (!%p213_p3), %s1310_s26, 7 }
   0xc   : > { %p1313_p8 = scmp.ne.s32.totalorder (!%p213_p3), %s1539_s18, 0 }
  0x10   : > { %s2062_s19 = smov (!%p259_p5, %s1543_s19), 1  ;;  %s2064_s27 = smov (!%p251_p6, %s250_s27), 3 }
  0x11   : > { %s2066_s26 = smov (!%p261_p7, %s1310_s26), 7  ;;  %s1431_s28 = smul.u32 160, %s2064_s27  ;;  %vm276_vm0 = vcmask (!%p1313_p8), 122880   ;;  %v1557_v0 = vmov (!%p1313_p8), 0.0  }
  0x12   : > { %s1311_s29 = sshll.u32 %s2062_s19, 3  ;;  %s1635_s8 = scalar_lea.vmem %s2048_s5, %s2062_s19 }
  0x13   : > { %s264_s30 = sadd.s32 %s1311_s29, %s2066_s26  ;;  %s1640_s11 = scalar_lea.vmem %s2043_s0, %s1431_s28  ;;  %277 = vst.msk [vmem:[%s1635_s8] sm:$0x1] (!%p1313_p8), %vm276_vm0, %v1557_v0 }
  0x14   : > { %s1312_s12 = sshll.u32 %s264_s30, 2  ;;  %275 = sbr.rel (%p1313_p8) target bundleno = 27 (0x1b), region = 40 }
  0x15   : > { %s1645_s15 = scalar_lea.vmem %s2047_s4, %s1312_s12 }
  0x1b PF: > { %v718_v1 = vld [vmem:[%s1640_s11] sm:$0xf]  ;;  %v1651_v2 = vld [vmem:[%s1640_s11 + $0x8] sm:$0xf]  ;;  %s1558_s16 = smov 120   ;;  %s1559_s17 = smov 16  }
  0x1c   : > { %v760_v3 = vshrl.u32 %v1651_v2, 16  ;;  %v763_v4 = vshll.u32 %v1651_v2, 16  ;;  %v1341_v5 = vcombine.low %v718_v1, %v1651_v2  ;;  %v746_v6 = vshrl.u32 %v718_v1, 16  ;;  %v737_v7 = vld [vmem:[%s1640_s11 + $0x60] sm:$0xf]  ;;  %s1560_s18 = smov 24  }
  0x1d   : > { %v749_v8 = vshll.u32 %v718_v1, 16  ;;  %v739_v9 = vld [vmem:[%s1640_s11 + $0x68] sm:$0xf]  ;;  %v830_v10 = vshrl.u32 %v737_v7, 16  ;;  %v833_v11 = vshll.u32 %v737_v7, 16  ;;  %s1561_s19 = smov 8  }
  0x1e   : > { %v762_v12 = vrot.slane %v760_v3, 4  ;;  %v765_v13 = vrot.slane %v763_v4, 5  ;;  %881 = vrot.lane.b32.xlu0 %v1341_v5, %s1558_s16  ;;  %v748_v14 = vrot.slane %v746_v6, 4  ;;  %v844_v15 = vshrl.u32 %v739_v9, 16  ;;  %v1660_v16 = vld [vmem:[%s1640_s11 + $0x10] sm:$0xf] }
  0x1f   : > { %v751_v17 = vrot.slane %v749_v8, 5  ;;  %v832_v18 = vrot.slane %v830_v10, 4  ;;  %v835_v19 = vrot.slane %v833_v11, 5  ;;  %v847_v20 = vshll.u32 %v739_v9, 16  ;;  %v1663_v21 = vld [vmem:[%s1640_s11 + $0x18] sm:$0xf] }
  0x20   : > { %v846_v22 = vrot.slane %v844_v15, 4  ;;  %v1348_v23 = vcombine.low %v737_v7, %v739_v9  ;;  %v774_v24 = vshrl.u32 %v1660_v16, 16  ;;  %v777_v25 = vshll.u32 %v1660_v16, 16  ;;  %v1486_v30 = vld [vmem:[%s1640_s11 + $0x88] ss:$8 sps:$4 sm:$0xff]   ;;  %s1562_s27 = smov 32  }
  0x21   : > { %v752_v26 = vor.u32 %v751_v17, %v748_v14  ;;  %v836_v27 = vor.u32 %v835_v19, %v832_v18  ;;  %v849_v28 = vrot.slane %v847_v20, 5  ;;  %v788_v29 = vshrl.u32 %v1663_v21, 16  ;;  %v733_v33 = vld [vmem:[%s1640_s11 + $0x50] sm:$0xf]  ;;  %v735_v34 = vld [vmem:[%s1640_s11 + $0x58] sm:$0xf] }
  0x22   : > { %917 = vrot.lane.b32.xlu1 %v1348_v23, %s1559_s17  ;;  %v791_v31 = vshll.u32 %v1663_v21, 16  ;;  %v1342_v32 = vcombine.low %v1660_v16, %v1663_v21  ;;  %v766_v35 = vor.u32 %v765_v13, %v762_v12  ;;  %v776_v36 = vrot.slane %v774_v24, 4  ;;  %v719_v41 = vld [vmem:[%s1640_s11 + $0x4] sm:$0x1]  ;;  %v721_v46 = vld [vmem:[%s1640_s11 + $0xc] sm:$0x1] }
  0x23   : > { %v753_v37 = vrot.slane %v752_v26, 4  ;;  %v1675_v38 = vrot.slane %v836_v27, 4  ;;  %v850_v39 = vor.u32 %v849_v28, %v846_v22  ;;  %v802_v40 = vshrl.u32 %v733_v33, 16  ;;  %v1488_v56 = vld [vmem:[%s1640_s11 + $0x78] ss:$8 sps:$4 sm:$0xff]   ;;  %s1563_s28 = smov 40  }
  0x24   : > { %883 = vrot.lane.b32.xlu0 %v1342_v32, %s1558_s16  ;;  %v805_v42 = vshll.u32 %v733_v33, 16  ;;  %v816_v43 = vshrl.u32 %v735_v34, 16  ;;  %v819_v44 = vshll.u32 %v735_v34, 16  ;;  %v1347_v45 = vcombine.low %v733_v33, %v735_v34  ;;  %v723_v58 = vld [vmem:[%s1640_s11 + $0x14] sm:$0x1]  ;;  %s1564_s9 = smov 48  }
  0x25   : > { %v1680_v47 = vrot.slane %v850_v39, 4  ;;  %v804_v48 = vrot.slane %v802_v40, 4  ;;  %vm305_vm1 = vsmask.f32 3328  ;;  %vm306_vm2 = vsmask.f32 7440 }
  0x26   : > { %931 = vrot.lane.b32.xlu1 %v1486_v30, %s1560_s18  ;;  %v807_v49 = vrot.slane %v805_v42, 5  ;;  %v818_v50 = vrot.slane %v816_v43, 4  ;;  %v821_v51 = vrot.slane %v819_v44, 5  ;;  %v755_v52 = vshll.u32 %v719_v41, 16  ;;  %vm1683_vm3 = vmor %vm305_vm1, %vm306_vm2  ;;  %v725_v59 = vld [vmem:[%s1640_s11 + $0x1c] sm:$0x1] }
  0x27   : > { %v767_v54 = vrot.slane %v766_v35, 4  ;;  %v769_v55 = vshll.u32 %v721_v46, 16  ;;  %v779_v60 = vrot.slane %v777_v25, 5  ;;  %v783_v0 = vshll.u32 %v723_v58, 16  ;;  %v734_v4 = vld [vmem:[%s1640_s11 + $0x54] sm:$0x1] }
  0x28   : > { %915 = vrot.lane.b32.xlu0 %v1347_v45, %s1559_s17  ;;  %v757_v57 = vrot.slane %v755_v52, 5  ;;  %v808_v61 = vor.u32 %v807_v49, %v804_v48  ;;  %v822_v62 = vor.u32 %v821_v51, %v818_v50  ;;  %v790_v1 = vrot.slane %v788_v29, 4  ;;  %v736_v8 = vld [vmem:[%s1640_s11 + $0x5c] sm:$0x1]  ;;  %v738_v10 = vld [vmem:[%s1640_s11 + $0x64] sm:$0x1] }
  0x29   : > { %v771_v63 = vrot.slane %v769_v55, 5  ;;  %v793_v3 = vrot.slane %v791_v31, 5  ;;  %v780_v6 = vor.u32 %v779_v60, %v776_v36  ;;  %v797_v7 = vshll.u32 %v725_v59, 16  ;;  %v740_v15 = vld [vmem:[%s1640_s11 + $0x6c] sm:$0x1]  ;;  %v1505_v41 = vld [vmem:[%s2044_s1 + $0x24] sm:$0xff]  }
  0x2a   : > { %v758_v5 = vsel %vm1683_vm3, %v753_v37, %v757_v57  ;;  %v809_v9 = vrot.slane %v808_v61, 4  ;;  %v785_v12 = vrot.slane %v783_v0, 5  ;;  %v811_v14 = vshll.u32 %v734_v4, 16  ;;  %v1702_v17 = vld [vmem:[%s1640_s11 + $0x20] sm:$0xf]  ;;  %1415 = vmatprep.subr.bf16.mxu1 %v1505_v41  ;;  %s1565_s13 = smov 56  }
  0x2b   : > { %v1698_v11 = vsel %vm1683_vm3, %v767_v54, %v771_v63  ;;  %v794_v13 = vor.u32 %v793_v3, %v790_v1  ;;  %v781_v19 = vrot.slane %v780_v6, 4  ;;  %v799_v20 = vrot.slane %v797_v7, 5  ;;  %v1722_v40 = vld [vmem:[%s1640_s11 + $0x30] sm:$0xf]  ;;  %v1733_v44 = vld [vmem:[%s1640_s11 + $0x38] sm:$0xf]  ;;  %1416 = vmatpush3.bf16.msra.mxu1 %v1505_v41 }
  0x2c   : > { %v1345_v18 = vcombine.low %v758_v5, %v1698_v11  ;;  %929 = vrot.lane.b32.xlu0 %v1488_v56, %s1560_s18  ;;  %v823_v22 = vrot.slane %v822_v62, 4  ;;  %v813_v24 = vrot.slane %v811_v14, 5  ;;  %v825_v25 = vshll.u32 %v736_v8, 16  ;;  %v1736_v45 = vld [vmem:[%s1640_s11 + $0x40] sm:$0xf] }
  0x2d   : > { %v795_v23 = vrot.slane %v794_v13, 4  ;;  %v839_v26 = vshll.u32 %v738_v10, 16  ;;  %v1709_v27 = vsel %vm1683_vm3, %v781_v19, %v785_v12  ;;  %v853_v28 = vshll.u32 %v740_v15, 16  ;;  %v727_v46 = vld [vmem:[%s1640_s11 + $0x24] sm:$0x1] }
  0x2e   : > { %901 = vrot.lane.b32.xlu1 %v1345_v18, %s1561_s19  ;;  %v858_v29 = vshrl.u32 %v1702_v17, 16  ;;  %v861_v30 = vshll.u32 %v1702_v17, 16  ;;  %v814_v32 = vsel %vm1683_vm3, %v809_v9, %v813_v24  ;;  %v827_v33 = vrot.slane %v825_v25, 5  ;;  %v1746_v51 = vld [vmem:[%s1640_s11] sm:$0xf] }
  0x2f   : > { %v1715_v31 = vsel %vm1683_vm3, %v795_v23, %v799_v20  ;;  %v841_v34 = vrot.slane %v839_v26, 5  ;;  %v855_v36 = vrot.slane %v853_v28, 5  ;;  %v1344_v50 = vcombine.low %v1733_v44, %v1736_v45  ;;  %v1752_v55 = vld [vmem:[%s1640_s11 + $0x48] sm:$0xf]  ;;  %v281_v60 = vld [vmem:[%s1640_s11 + $0xc] sm:$0x1] }
  0x30   : > { %v1346_v35 = vcombine.low %v1709_v27, %v1715_v31  ;;  %v860_v37 = vrot.slane %v858_v29, 4  ;;  %v863_v39 = vrot.slane %v861_v30, 5  ;;  %v828_v42 = vsel %vm1683_vm3, %v823_v22, %v827_v33  ;;  %v1755_v57 = vld [vmem:[%s1640_s11 + $0x8] sm:$0xf]  ;;  %v1775_v6 = vld [vmem:[%s1640_s11 + $0x18] sm:$0xf] }
  0x31   : > { %v842_v43 = vsel %vm1683_vm3, %v1675_v38, %v841_v34  ;;  %v1351_v48 = vcombine.low %v814_v32, %v828_v42  ;;  %v856_v49 = vsel %vm1683_vm3, %v1680_v47, %v855_v36  ;;  %v279_v38 = vld [vmem:[%s1640_s11 + $0x4] sm:$0x1]  ;;  %v1353_v54 = vcombine.low %v1651_v2, %v1660_v16  ;;  %v1765_v16 = vld [vmem:[%s1640_s11 + $0x10] sm:$0xf]  ;;  %v285_v10 = vld [vmem:[%s1640_s11 + $0x1c] sm:$0x1] }
  0x32   : > { %903 = vrot.lane.b32.xlu1 %v1346_v35, %s1561_s19  ;;  %v1352_v52 = vcombine.low %v842_v43, %v856_v49  ;;  %v864_v56 = vor.u32 %v863_v39, %v860_v37  ;;  %v1354_v47 = vcombine.low %v1663_v21, %v1702_v17  ;;  %v1355_v58 = vcombine.low %v1722_v40, %v1733_v44  ;;  %v283_v21 = vld [vmem:[%s1640_s11 + $0x14] sm:$0x1]  ;;  %v1783_v14 = vld [vmem:[%s1640_s11 + $0x28] sm:$0xf]  ;;  %v1789_v19 = vld [vmem:[%s1640_s11 + $0x50] sm:$0xf] }
  0x33   : > { %939 = vrot.lane.b32.xlu0 %v1351_v48, %s1562_s27  ;;  %v867_v59 = vshll.u32 %v727_v46, 16  ;;  %v309_v2 = vshrl.u32 %v1746_v51, 16  ;;  %v312_v62 = vshll.u32 %v1746_v51, 16  ;;  %v318_v63 = vshll.u32 %v279_v38, 16  ;;  %v1506_v20 = vld [vmem:[%s2044_s1 + $0x2c] sm:$0xff]   ;;  %v1507_v30 = vld [vmem:[%s2044_s1 + $0x34] sm:$0xff]  }
  0x34   : > { %v865_v61 = vrot.slane %v864_v56, 4  ;;  %v323_v0 = vshrl.u32 %v1755_v57, 16  ;;  %v1356_v1 = vcombine.low %v1736_v45, %v1752_v55  ;;  %v326_v5 = vshll.u32 %v1755_v57, 16  ;;  %v1797_v23 = vld [vmem:[%s1640_s11 + $0x30] sm:$0xf]  ;;  %1417 = vmatprep.subr.bf16.mxu1 %v1506_v20  ;;  %v1508_v43 = vld [vmem:[%s2044_s1 + $0x3c] sm:$0xff]  }
  0x35   : > { %v869_v3 = vrot.slane %v867_v59, 5  ;;  %v311_v4 = vrot.slane %v309_v2, 4  ;;  %v314_v7 = vrot.slane %v312_v62, 5  ;;  %v332_v9 = vshll.u32 %v281_v60, 16  ;;  %v1806_v35 = vld [vmem:[%s1640_s11 + $0x58] sm:$0xf]  ;;  %1418 = vmatpush3.bf16.msra.mxu1 %v1506_v20 }
  0x36   : > { %941 = vrot.lane.b32.xlu1 %v1352_v52, %s1562_s27  ;;  %v325_v8 = vrot.slane %v323_v0, 4  ;;  %v337_v12 = vshrl.u32 %v1765_v16, 16  ;;  %v1357_v13 = vcombine.low %v1698_v11, %v1709_v27  ;;  %v1785_v15 = vrot.slane %v318_v63, 5  ;;  %1419 = vmatprep.subr.bf16.mxu1 %v1507_v30  ;;  %v1817_v49 = vld [vmem:[%s1640_s11 + $0x38] sm:$0xf] }
  0x37   : > { %947 = vrot.lane.b32.xlu0 %v1353_v54, %s1563_s28  ;;  %v328_v17 = vrot.slane %v326_v5, 5  ;;  %v340_v18 = vshll.u32 %v1765_v16, 16  ;;  %v870_v22 = vsel %vm1683_vm3, %v865_v61, %v869_v3  ;;  %v315_v11 = vor.u32 %v314_v7, %v311_v4  ;;  %v1821_v54 = vld [vmem:[%s1640_s11 + $0x60] sm:$0xf]  ;;  %v1826_v59 = vld [vmem:[%s1640_s11 + $0x68] sm:$0xf] }
  0x38   : > { %v339_v24 = vrot.slane %v337_v12, 4  ;;  %v346_v25 = vshll.u32 %v283_v21, 16  ;;  %v351_v28 = vshrl.u32 %v1775_v6, 16  ;;  %v354_v29 = vshll.u32 %v1775_v6, 16  ;;  %v294_v3 = vld [vmem:[%s1640_s11 + $0x54] sm:$0x1] }
  0x39   : > { %v329_v26 = vor.u32 %v328_v17, %v325_v8  ;;  %v342_v27 = vrot.slane %v340_v18, 5  ;;  %v316_v32 = vrot.slane %v315_v11, 4  ;;  %v334_v33 = vrot.slane %v332_v9, 5  ;;  %1420 = vmatpush3.bf16.msra.mxu1 %v1507_v30  ;;  %v296_v9 = vld [vmem:[%s1640_s11 + $0x5c] sm:$0x1]  ;;  %v1512_v18 = vld [vmem:[%s2044_s1] sm:$0xff]  }
  0x3a   : > { %949 = vrot.lane.b32.xlu1 %v1354_v47, %s1563_s28  ;;  %v360_v34 = vshll.u32 %v285_v10, 16  ;;  %v365_v36 = vshrl.u32 %v1789_v19, 16  ;;  %v353_v41 = vrot.slane %v351_v28, 4  ;;  %v356_v42 = vrot.slane %v354_v29, 5  ;;  %1421 = vmatprep.subr.bf16.mxu1 %v1508_v43  ;;  %v300_v17 = vld [vmem:[%s1640_s11 + $0x6c] sm:$0x1] }
  0x3b   : > { %955 = vrot.lane.b32.xlu0 %v1355_v58, %s1564_s9  ;;  %v330_v37 = vrot.slane %v329_v26, 4  ;;  %v343_v39 = vor.u32 %v342_v27, %v339_v24  ;;  %v1358_v46 = vcombine.low %v1715_v31, %v870_v22  ;;  %v1316_v48 = vcombine.low %v1783_v14, %v1797_v23  ;;  %v1829_v31 = vld [vmem:[%s1640_s11 + $0x40] sm:$0xf]  ;;  %1401 = vmatprep.subr.bf16.mxu0 %v1512_v18 }
  0x3c   : > { %v348_v38 = vrot.slane %v346_v25, 5  ;;  %v368_v52 = vshll.u32 %v1789_v19, 16  ;;  %v357_v56 = vor.u32 %v356_v42, %v353_v41  ;;  %v362_v47 = vrot.slane %v360_v34, 5  ;;  %1402 = vmatpush3.bf16.msra.mxu0 %v1512_v18  ;;  %v1938_v53 = vld [vmem:[%s2046_s3] ss:$0 sm:$0xff] }
  0x3d   : > { %v344_v55 = vrot.slane %v343_v39, 4  ;;  %v379_v58 = vshrl.u32 %v1806_v35, 16  ;;  %v321_v60 = vsel %vm1683_vm3, %v316_v32, %v1785_v15  ;;  %v367_v2 = vrot.slane %v365_v36, 4  ;;  %v298_v15 = vld [vmem:[%s1640_s11 + $0x64] sm:$0x1]  ;;  %1422 = vmatpush3.bf16.msra.mxu1 %v1508_v43 }
  0x3e   : > { %957 = vrot.lane.b32.xlu1 %v1356_v1, %s1564_s9  ;;  %v370_v61 = vrot.slane %v368_v52, 5  ;;  %v382_v62 = vshll.u32 %v1806_v35, 16  ;;  %v1838_v63 = vsel %vm1683_vm3, %v330_v37, %v334_v33  ;;  %v358_v0 = vrot.slane %v357_v56, 4  ;;  %v286_v36 = vld [vmem:[%s1640_s11 + $0x20] sm:$0xf]  ;;  %v1513_v37 = vld [vmem:[%s2044_s1 + $0x8] sm:$0xff]  }
  0x3f   : > { %962 = vrot.lane.b32.xlu0 %v1357_v13, %s1565_s13  ;;  %v381_v21 = vrot.slane %v379_v58, 4  ;;  %v393_v1 = vshrl.u32 %v1821_v54, 16  ;;  %v396_v5 = vshll.u32 %v1821_v54, 16  ;;  %v407_v7 = vshrl.u32 %v1826_v59, 16  ;;  %1403 = vmatprep.subr.bf16.mxu0 %v1513_v37 }
  0x40   : > { %v384_v4 = vrot.slane %v382_v62, 5  ;;  %v410_v8 = vshll.u32 %v1826_v59, 16  ;;  %v1317_v10 = vcombine.low %v1817_v49, %v1829_v31  ;;  %v1851_v12 = vsel %vm1683_vm3, %v344_v55, %v348_v38  ;;  %1404 = vmatpush3.bf16.msra.mxu0 %v1513_v37 }
  0x41   : > { %v1855_v13 = vsel %vm1683_vm3, %v358_v0, %v362_v47  ;;  %v395_v14 = vrot.slane %v393_v1, 4  ;;  %v398_v20 = vrot.slane %v396_v5, 5  ;;  %v409_v22 = vrot.slane %v407_v7, 4  ;;  %v1515_v5 = vld [vmem:[%s2044_s1 + $0x18] sm:$0xff]  }
  0x42   : > { %964 = vrot.lane.b32.xlu1 %v1358_v46, %s1565_s13  ;;  %v412_v11 = vrot.slane %v410_v8, 5  ;;  %v371_v24 = vor.u32 %v370_v61, %v367_v2  ;;  %v1318_v25 = vcombine.low %v321_v60, %v1838_v63  ;;  %v374_v26 = vshll.u32 %v294_v3, 16  ;;  %v1509_v60 = vld [vmem:[%s2044_s1 + $0x44] ss:$0 sps:$4 sm:$0xff]  }
  0x43   : > { %454 = vrot.lane.b32.xlu0 %v1316_v48, %s1561_s19  ;;  %v385_v27 = vor.u32 %v384_v4, %v381_v21  ;;  %v388_v28 = vshll.u32 %v296_v9, 16  ;;  %v399_v29 = vor.u32 %v398_v20, %v395_v14  ;;  %v402_v30 = vshll.u32 %v298_v15, 16  ;;  %v287_v8 = vld [vmem:[%s1640_s11 + $0x24] sm:$0x1]  ;;  %v1516_v9 = vld [vmem:[%s2044_s1 + $0x20] ss:$0 sps:$4 sm:$0xff]  }
  0x44   : > { %v413_v32 = vor.u32 %v412_v11, %v409_v22  ;;  %v416_v33 = vshll.u32 %v300_v17, 16  ;;  %v1319_v34 = vcombine.low %v1851_v12, %v1855_v13  ;;  %v372_v39 = vrot.slane %v371_v24, 4  ;;  %v292_v22 = vld [vmem:[%s1640_s11 + $0x48] sm:$0xf] }
  0x45   : > { %v376_v41 = vrot.slane %v374_v26, 5  ;;  %v386_v42 = vrot.slane %v385_v27, 4  ;;  %v390_v43 = vrot.slane %v388_v28, 5  ;;  %v1320_v46 = vcombine.low %v1789_v19, %v1806_v35  ;;  %v1499_v19 = vld [vmem:[%s1640_s11 + $0x78] ss:$8 sps:$4 sm:$0xff]   ;;  %v1514_v35 = vld [vmem:[%s2044_s1 + $0x10] sm:$0xff]  }
  0x46   : > { %456 = vrot.lane.b32.xlu1 %v1317_v10, %s1561_s19  ;;  %v400_v48 = vrot.slane %v399_v29, 4  ;;  %v404_v38 = vrot.slane %v402_v30, 5  ;;  %v414_v52 = vrot.slane %v413_v32, 4  ;;  %v418_v55 = vrot.slane %v416_v33, 5  ;;  %1405 = vmatprep.subr.bf16.mxu0 %v1514_v35  ;;  %v728_v33 = vld [vmem:[%s1640_s11 + $0x28] sm:$0xf] }
  0x47   : > { %464 = vrot.lane.b32.xlu0 %v1318_v25, %s1559_s17  ;;  %v1321_v56 = vcombine.low %v1821_v54, %v1826_v59  ;;  %v421_v47 = vshrl.u32 %v286_v36, 16  ;;  %v424_v58 = vshll.u32 %v286_v36, 16  ;;  %v377_v2 = vsel %vm1683_vm3, %v372_v39, %v376_v41  ;;  %v1500_v54 = vld [vmem:[%s1640_s11 + $0x88] ss:$8 sps:$4 sm:$0xff]   ;;  %1406 = vmatpush3.bf16.msra.mxu0 %v1514_v35 }
  0x48   : > { %v391_v61 = vsel %vm1683_vm3, %v386_v42, %v390_v43  ;;  %v405_v59 = vsel %vm1683_vm3, %v400_v48, %v404_v38  ;;  %v419_v62 = vsel %vm1683_vm3, %v414_v52, %v418_v55  ;;  %vm612_vm4 = vcmask 1043456   ;;  %1407 = vmatprep.subr.bf16.mxu0 %v1515_v5 }
  0x49   : > { %v423_v0 = vrot.slane %v421_v47, 4  ;;  %v426_v21 = vrot.slane %v424_v58, 5  ;;  %1430 = vmatprep.subr.msk.bf16.mxu1 %vm612_vm4, %v1509_v60  ;;  %v1042_v1 = vsel %vm612_vm4, %v1509_v60, 0  ;;  %v1314_v3 = vcombine.low %v1746_v51, %v1755_v57 }
  0x4a   : > { %466 = vrot.lane.b32.xlu1 %v1319_v34, %s1559_s17  ;;  %v1315_v4 = vcombine.low %v1765_v16, %v1775_v6  ;;  %v1324_v7 = vcombine.low %v377_v2, %v391_v61  ;;  %1424 = vmatpush3.bf16.msra.mxu1 %v1042_v1  ;;  %v1325_v10 = vcombine.low %v405_v59, %v419_v62  ;;  %v430_v15 = vshll.u32 %v287_v8, 16 }
  0x4b   : > { %478 = vrot.lane.b32.xlu0 %v1320_v46, %s1560_s18  ;;  %v427_v14 = vor.u32 %v426_v21, %v423_v0  ;;  %1408 = vmatpush3.bf16.msra.mxu0 %v1515_v5  ;;  %v1326_v17 = vcombine.low %v1755_v57, %v1765_v16  ;;  %v614_v18 = vsel %vm612_vm4, %v1516_v9, 0  ;;  %v1327_v20 = vcombine.low %v1775_v6, %v286_v36 }
  0x4c   : > { %1429 = vmatprep.subr.msk.bf16.mxu0 %vm612_vm4, %v1516_v9  ;;  %v432_v24 = vrot.slane %v430_v15, 5  ;;  %v1328_v25 = vcombine.low %v1797_v23, %v1817_v49  ;;  %v1329_v26 = vcombine.low %v1829_v31, %v292_v22  ;;  %v1330_v28 = vcombine.low %v1838_v63, %v1851_v12  ;;  %v1933_v23 = vld [vmem:[%s2045_s2] ss:$0 sm:$0xff] }
  0x4d   : > { %v428_v11 = vrot.slane %v427_v14, 4  ;;  %v1343_v34 = vcombine.low %v728_v33, %v1722_v40  ;;  %vm529_vm5 = vcmask 64512   ;;  %vm536_vm6 = vcmask 130048  }
  0x4e   : > { %480 = vrot.lane.b32.xlu1 %v1321_v56, %s1560_s18  ;;  %vm541_vm7 = vcmask 195584   ;;  %vm546_vm8 = vcmask 261120   ;;  %vm551_vm9 = vcmask 326656   ;;  %vm556_vm10 = vcmask 392192  }
  0x4f   : > { %492 = vrot.lane.b32.xlu0 %v1499_v19, %s1562_s27  ;;  %1410 = vmatpush3.bf16.msra.mxu0 %v614_v18  ;;  %v433_v27 = vsel %vm1683_vm3, %v428_v11, %v432_v24  ;;  %vm561_vm11 = vcmask 457728   ;;  %vm566_vm12 = vcmask 523264   ;;  %vm607_vm13 = vcmask 588800  }
  0x50   : > { %v1331_v29 = vcombine.low %v1855_v13, %v433_v27  ;;  %vm695_vm14 = vcmask 60416   ;;  %vm716_vm15 = vcmask 57344   ;;  %vm1151_vm0 = vcmask 126016  }
  0x51   : > { %vm1190_vm1 = vcmask 122944  }
  0x52   : > { %494 = vrot.lane.b32.xlu1 %v1500_v54, %s1562_s27  ;;  %s1566_s27 = smov 64  }
  0x53   : > { %502 = vrot.lane.b32.xlu0 %v1324_v7, %s1563_s28 }
  0x56   : > { %504 = vrot.lane.b32.xlu1 %v1325_v10, %s1563_s28 }
  0x57   : > { %510 = vrot.lane.b32.xlu0 %v1326_v17, %s1564_s9 }
  0x5a   : > { %512 = vrot.lane.b32.xlu1 %v1327_v20, %s1564_s9 }
  0x5b   : > { %518 = vrot.lane.b32.xlu0 %v1328_v25, %s1565_s13 }
  0x5e   : > { %520 = vrot.lane.b32.xlu1 %v1329_v26, %s1565_s13 }
  0x5f   : > { %525 = vrot.lane.b32.xlu0 %v1330_v28, %s1566_s27 }
  0x62   : > { %527 = vrot.lane.b32.xlu1 %v1331_v29, %s1566_s27 }
  0x63   : > { %1100 = vrot.lane.b32.xlu0 %v1933_v23, %s1558_s16 }
  0x66   : > { %1112 = vrot.lane.b32.xlu1 %v1938_v53, %s1558_s16 }
  0x90   : > { %v882_v49 = vpop.permute.xlu0 %881 }
  0x91   : > { %v968_v39 = vsel %vm529_vm5, %v882_v49, %v1343_v34 }
  0x94   : > { %v918_v31 = vpop.permute.xlu1 %917 }
  0x96   : > { %v884_v63 = vpop.permute.xlu0 %883 }
  0x97   : > { %v971_v41 = vsel %vm529_vm5, %v884_v63, %v1344_v50 }
  0x98   : > { %v932_v12 = vpop.permute.xlu1 %931 }
  0x9a   : > { %v916_v13 = vpop.permute.xlu0 %915 }
  0x9e   : > { %v930_v32 = vpop.permute.xlu0 %929 }
  0xa0   : > { %v902_v30 = vpop.permute.xlu1 %901 }
  0xa1   : > { %v973_v43 = vsel %vm536_vm6, %v968_v39, %v902_v30 }
  0xa2   : > { %v977_v40 = vsel %vm541_vm7, %v973_v43, %v916_v13 }
  0xa3   : > { %v981_v44 = vsel %vm546_vm8, %v977_v40, %v930_v32 }
  0xa4   : > { %v904_v36 = vpop.permute.xlu1 %903 }
  0xa5   : > { %v940_v37 = vpop.permute.xlu0 %939  ;;  %v975_v46 = vsel %vm536_vm6, %v971_v41, %v904_v36 }
  0xa6   : > { %v979_v38 = vsel %vm541_vm7, %v975_v46, %v918_v31  ;;  %v985_v50 = vsel %vm551_vm9, %v981_v44, %v940_v37 }
  0xa7   : > { %v983_v45 = vsel %vm546_vm8, %v979_v38, %v932_v12 }
  0xa8   : > { %v942_v42 = vpop.permute.xlu1 %941 }
  0xa9   : > { %v948_v48 = vpop.permute.xlu0 %947  ;;  %v987_v58 = vsel %vm551_vm9, %v983_v45, %v942_v42 }
  0xaa   : > { %v989_v47 = vsel %vm556_vm10, %v985_v50, %v948_v48 }
  0xac   : > { %v950_v52 = vpop.permute.xlu1 %949 }
  0xad   : > { %v956_v55 = vpop.permute.xlu0 %955  ;;  %v991_v35 = vsel %vm556_vm10, %v987_v58, %v950_v52 }
  0xae   : > { %v993_v60 = vsel %vm561_vm11, %v989_v47, %v956_v55 }
  0xb0   : > { %v958_v56 = vpop.permute.xlu1 %957 }
  0xb1   : > { %v963_v19 = vpop.permute.xlu0 %962  ;;  %v995_v61 = vsel %vm561_vm11, %v991_v35, %v958_v56 }
  0xb2   : > { %v997_v2 = vsel %vm566_vm12, %v993_v60, %v963_v19 }
  0xb3   : > { %1425 = vmatprep.mubr.msk.bf16.mxu1 %vm607_vm13, %v997_v2 }
  0xb4   : > { %v965_v54 = vpop.permute.xlu1 %964 }
  0xb5   : > { %v999_v59 = vsel %vm566_vm12, %v995_v61, %v965_v54  ;;  %v455_v62 = vpop.permute.xlu0 %454 }
  0xb6   : > { %1426 = vmatmul.mubr.msk.bf16.vlgmr.msra.gmra.mrb[0].mxu1 %vm607_vm13, %v999_v59  ;;  %v532_v5 = vsel %vm529_vm5, %v1314_v3, %v455_v62  ;;  %v1567_v62 = vmov 1966171168  }
  0xb8   : > { %v457_v0 = vpop.permute.xlu1 %456 }
  0xb9   : > { %v465_v21 = vpop.permute.xlu0 %464  ;;  %v535_v8 = vsel %vm529_vm5, %v1315_v4, %v457_v0  ;;  %v1173_v0 = vunpack.c.l.s4 %v1567_v62 }
  0xba   : > { %v538_v10 = vsel %vm536_vm6, %v532_v5, %v465_v21  ;;  %v1175_v21 = vlaneseq }
  0xbc   : > { %v467_v1 = vpop.permute.xlu1 %466 }
  0xbd   : > { %v479_v7 = vpop.permute.xlu0 %478  ;;  %v540_v15 = vsel %vm536_vm6, %v535_v8, %v467_v1  ;;  %v1176_v8 = vshrl.u32 %v1175_v21, 7 }
  0xbe   : > { %v543_v17 = vsel %vm541_vm7, %v538_v10, %v479_v7  ;;  %v1174_v7 = vunpack.c.0.s8 %v1173_v0 }
  0xc0   : > { %v481_v9 = vpop.permute.xlu1 %480 }
  0xc1   : > { %v493_v14 = vpop.permute.xlu0 %492  ;;  %v545_v20 = vsel %vm541_vm7, %v540_v15, %v481_v9 }
  0xc2   : > { %v548_v57 = vsel %vm546_vm8, %v543_v17, %v493_v14  ;;  %v1177_v14 = vsub.s32 %v1174_v7, %v1176_v8 }
  0xc4   : > { %v495_v18 = vpop.permute.xlu1 %494 }
  0xc5   : > { %v503_v51 = vpop.permute.xlu0 %502  ;;  %v550_v22 = vsel %vm546_vm8, %v545_v20, %v495_v18 }
  0xc6   : > { %v553_v16 = vsel %vm551_vm9, %v548_v57, %v503_v51 }
  0xc8   : > { %v505_v3 = vpop.permute.xlu1 %504 }
  0xc9   : > { %v511_v6 = vpop.permute.xlu0 %510  ;;  %v555_v4 = vsel %vm551_vm9, %v550_v22, %v505_v3 }
  0xca   : > { %v558_v24 = vsel %vm556_vm10, %v553_v16, %v511_v6 }
  0xcc   : > { %v513_v11 = vpop.permute.xlu1 %512 }
  0xcd   : > { %v519_v25 = vpop.permute.xlu0 %518  ;;  %v560_v26 = vsel %vm556_vm10, %v555_v4, %v513_v11 }
  0xce   : > { %v563_v27 = vsel %vm561_vm11, %v558_v24, %v519_v25 }
  0xd0   : > { %v521_v28 = vpop.permute.xlu1 %520 }
  0xd1   : > { %v565_v29 = vsel %vm561_vm11, %v560_v26, %v521_v28  ;;  %v526_v49 = vpop.permute.xlu0 %525 }
  0xd2   : > { %v568_v31 = vsel %vm566_vm12, %v563_v27, %v526_v49 }
  0xd3   : > { %1411 = vmatprep.mubr.msk.bf16.mxu0 %vm607_vm13, %v568_v31 }
  0xd4   : > { %v528_v63 = vpop.permute.xlu1 %527 }
  0xd5   : > { %v570_v12 = vsel %vm566_vm12, %v565_v29, %v528_v63  ;;  %v1101_v13 = vpop.permute.xlu0 %1100 }
  0xd6   : > { %1412 = vmatmul.mubr.msk.bf16.vlgmr.msra.gmra.mrb[0].mxu0 %vm607_vm13, %v570_v12 }
  0xd8   : > { %v1113_v34 = vpop.permute.xlu1 %1112 }
 0x189   : > { %v1427_v30 = vpop.f32.mrb[0].mxu1 }
 0x18a   : > { %v1105_v32 = vmul.f32 %v1427_v30, %v1101_v13  ;;  %v1078_v33 = vpop.f32.mrb[1].mxu1 }
 0x18b   : > { %v1103_v36 = vmul.f32 %v1101_v13, %v1078_v33  ;;  %v1428_v37 = vpop.f32.mrb[2].mxu1 }
 0x18c   : > { %v1106_v39 = vmul.f32 %v1428_v37, %v1101_v13  ;;  %v1081_v41 = vpop.f32.mrb[3].mxu1  ;;  %v1117_v43 = vadd.f32 %v1113_v34, %v1105_v32 }
 0x18d   : > { %v1115_v42 = vadd.f32 %v1113_v34, %v1103_v36  ;;  %v1104_v46 = vmul.f32 %v1101_v13, %v1081_v41 }
 0x18e   : > { %v1118_v48 = vadd.f32 %v1113_v34, %v1106_v39  ;;  %v1121_v44 = vmax.f32 %v1117_v43, 0.0 }
 0x18f   : > { %v1119_v40 = vmax.f32 %v1115_v42, 0.0  ;;  %v1116_v38 = vadd.f32 %v1113_v34, %v1104_v46 }
 0x190   : > { %v1122_v45 = vmax.f32 %v1118_v48, 0.0  ;;  %v1385_v60 = vpack.c.bf16 %v1121_v44, %v1121_v44  ;;  %v1160_v19 = vsel %vm529_vm5, %v1121_v44, 0.0 }
 0x191   : > { %v1120_v52 = vmax.f32 %v1116_v38, 0.0  ;;  %v1383_v55 = vpack.c.bf16 %v1119_v40, %v1119_v40  ;;  %v1157_v50 = vsel %vm529_vm5, %v1119_v40, 0.0  ;;  %v700_v40 = vld [vmem:[%s1635_s8] sm:$0x1] }
 0x192   : > { %v1162_v2 = vsel %vm529_vm5, %v1122_v45, 0.0  ;;  %v1386_v25 = vpack.c.bf16 %v1122_v45, %v1122_v45 }
 0x193   : > { %v1158_v56 = vsel %vm529_vm5, %v1120_v52, 0.0  ;;  %1139 = vrot.lane.b32.xlu1 %v1383_v55, %s1561_s19  ;;  %v1384_v47 = vpack.c.bf16 %v1120_v52, %v1120_v52 }
 0x194   : > { %v1159_v58 = vadd.f32 %v1158_v56, %v1157_v50 }
 0x195   : > { %1141 = vrot.lane.b32.xlu0 %v1384_v47, %s1561_s19 }
 0x196   : > { %v1161_v35 = vadd.f32 %v1160_v19, %v1159_v58 }
 0x197   : > { %1143 = vrot.lane.b32.xlu1 %v1385_v60, %s1561_s19 }
 0x198   : > { %v1163_v61 = vadd.f32 %v1162_v2, %v1161_v35 }
 0x19a   : > { %v1164_v54 = vrot.slane %v1163_v61, 4 }
 0x19c   : > { %v1165_v59 = vadd.f32 %v1164_v54, %v1163_v61 }
 0x19e   : > { %v1166_v1 = vrot.slane %v1165_v59, 2 }
 0x1a0   : > { %v1167_v5 = vadd.f32 %v1166_v1, %v1165_v59 }
 0x1a2   : > { %v1168_v9 = vrot.slane %v1167_v5, 1 }
 0x1a4   : > { %v1169_v10 = vadd.f32 %v1168_v9, %v1167_v5 }
 0x1a6   : > { %v1170_v15 = vmul.f32 0.015625, %v1169_v10 }
 0x1a8   : > { %v1178_v17 = vrot.slane %v1170_v15, %v1177_v14 }
 0x1a9   : > { %v1413_v18 = vpop.f32.mrb[0].mxu0 }
 0x1aa   : > { %v1185_v20 = vrot.slane %v1178_v17, %v1177_v14  ;;  %v675_v51 = vmul.f32 %v1413_v18, %v1933_v23  ;;  %v650_v57 = vpop.f32.mrb[1].mxu0 }
 0x1ab   : > { %v673_v3 = vmul.f32 %v1933_v23, %v650_v57  ;;  %v1414_v22 = vpop.f32.mrb[2].mxu0 }
 0x1ac   : > { %1186 = vrot.lane.b32.xlu0 %v1185_v20, %s1561_s19  ;;  %v685_v16 = vadd.f32 %v1938_v53, %v675_v51  ;;  %v676_v6 = vmul.f32 %v1414_v22, %v1933_v23  ;;  %v653_v4 = vpop.f32.mrb[3].mxu0 }
 0x1ad   : > { %v683_v11 = vadd.f32 %v1938_v53, %v673_v3  ;;  %v674_v24 = vmul.f32 %v1933_v23, %v653_v4 }
 0x1ae   : > { %v689_v26 = vmax.f32 %v685_v16, 0.0  ;;  %v686_v27 = vadd.f32 %v1938_v53, %v676_v6 }
 0x1af   : > { %v687_v28 = vmax.f32 %v683_v11, 0.0  ;;  %v684_v29 = vadd.f32 %v1938_v53, %v674_v24 }
 0x1b0   : > { %1145 = vrot.lane.b32.xlu0 %v1386_v25, %s1561_s19  ;;  %v693_v49 = vpack.c.bf16 %v689_v26, %v689_v26  ;;  %v690_v31 = vmax.f32 %v686_v27, 0.0  ;;  %v704_v30 = vsel %vm529_vm5, %v689_v26, 0.0 }
 0x1b1   : > { %v691_v63 = vpack.c.bf16 %v687_v28, %v687_v28  ;;  %v701_v12 = vsel %vm529_vm5, %v687_v28, 0.0  ;;  %v688_v13 = vmax.f32 %v684_v29, 0.0 }
 0x1b2   : > { %v694_v23 = vpack.c.bf16 %v690_v31, %v690_v31  ;;  %698 = vst.msk [vmem:[%s1645_s15 + $0x8] sm:$0xf] %vm695_vm14, %v693_v49  ;;  %v706_v34 = vsel %vm529_vm5, %v690_v31, 0.0 }
 0x1b3   : > { %v692_v32 = vpack.c.bf16 %v688_v13, %v688_v13  ;;  %v702_v33 = vsel %vm529_vm5, %v688_v13, 0.0  ;;  %696 = vst.msk [vmem:[%s1645_s15] sm:$0xf] %vm695_vm14, %v691_v63 }
 0x1b4   : > { %v703_v53 = vadd.f32 %v702_v33, %v701_v12  ;;  %699 = vst.msk [vmem:[%s1645_s15 + $0xc] sm:$0xf] %vm695_vm14, %v694_v23 }
 0x1b5   : > { %697 = vst.msk [vmem:[%s1645_s15 + $0x4] sm:$0xf] %vm695_vm14, %v692_v32 }
 0x1b6   : > { %v705_v36 = vadd.f32 %v704_v30, %v703_v53 }
 0x1b8   : > { %v707_v37 = vadd.f32 %v706_v34, %v705_v36 }
 0x1ba   : > { %v708_v39 = vrot.slane %v707_v37, 4 }
 0x1bc   : > { %v709_v41 = vadd.f32 %v708_v39, %v707_v37 }
 0x1be   : > { %v710_v42 = vrot.slane %v709_v41, 2 }
 0x1c0   : > { %v711_v43 = vadd.f32 %v710_v42, %v709_v41 }
 0x1c2   : > { %v712_v46 = vrot.slane %v711_v43, 1 }
 0x1c4   : > { %v713_v48 = vadd.f32 %v712_v46, %v711_v43 }
 0x1c6   : > { %v714_v38 = vmul.f32 0.015625, %v713_v48 }
 0x1c8   : > { %v715_v52 = vadd.f32 %v714_v38, %v700_v40 }
 0x1ca   : > { %717 = vst.msk [vmem:[%s1635_s8] sm:$0x1] %vm716_vm15, %v715_v52 }
 0x1d1   : > { %v1156_v50 = vld [vmem:[%s1635_s8] sm:$0x1] }
 0x205   : > { %v1140_v55 = vpop.permute.xlu1 %1139 }
 0x206   : > { %1152 = vst.msk [vmem:[%s1645_s15] sm:$0xf] %vm1151_vm0, %v1140_v55 }
 0x207   : > { %v1142_v44 = vpop.permute.xlu0 %1141 }
 0x208   : > { %1153 = vst.msk [vmem:[%s1645_s15 + $0x4] sm:$0xf] %vm1151_vm0, %v1142_v44 }
 0x209   : > { %v1144_v45 = vpop.permute.xlu1 %1143 }
 0x20a   : > { %1154 = vst.msk [vmem:[%s1645_s15 + $0x8] sm:$0xf] %vm1151_vm0, %v1144_v45 }
 0x21e   : > { %v1187_v56 = vpop.permute.xlu0 %1186 }
 0x21f   : > { %v1189_v47 = vadd.f32 %v1187_v56, %v1156_v50 }
 0x221   : > { %1191 = vst.msk [vmem:[%s1635_s8] sm:$0x1] %vm1190_vm1, %v1189_v47 }
 0x222   : > { %v1146_v58 = vpop.permute.xlu0 %1145 }
 0x223   : > { %1155 = vst.msk [vmem:[%s1645_s15 + $0xc] sm:$0xf] %vm1151_vm0, %v1146_v58 }
 0x224 PF: > { %s16_s22 = sadd.s32 1, %s1555_s22   ;;  %s2051_s18 = smov %s1547_s20 }
 0x225   : > { %p13_p9 = scmp.ge.s32.totalorder %s16_s22, 6   ;;  %s2052_s19 = smov %s1551_s21 }
 0x226   : > { %s2053_s20 = smov %s2056_s23  ;;  %s2054_s21 = smov %s2060_s24 }
 0x227   :  { %15 = sbr.rel (!%p13_p9) target bundleno = 3 (0x3), region = 83 }

</bundles_post_ra>
